<compile_context>
chip_gen: v6e
topology: v6e:2x2x1
jax: 0.10.0
libtpu: 0.0.40
codegen_flags: <defaults>
</compile_context>

<pallas_src>
from functools import partial

import jax
import jax.numpy as jnp
from jax.experimental import pallas as pl
from jax.experimental.pallas import tpu as pltpu


def _interp_matrix(in_size: int, out_size: int) -> jnp.ndarray:
    """Bilinear interpolation matrix, PyTorch align_corners=False semantics."""
    scale = in_size / out_size
    dst = jnp.arange(out_size, dtype=jnp.float32)
    src = (dst + 0.5) * scale - 0.5
    src = jnp.maximum(src, 0.0)                      # PyTorch clamps negative src to 0
    i0 = jnp.minimum(jnp.floor(src).astype(jnp.int32), in_size - 1)
    i1 = jnp.minimum(i0 + 1, in_size - 1)
    lam = src - i0.astype(jnp.float32)
    A = jnp.zeros((out_size, in_size), jnp.float32)
    A = A.at[jnp.arange(out_size), i0].add(1.0 - lam)
    A = A.at[jnp.arange(out_size), i1].add(lam)
    return A


def _kernel(x_ref, w_ref, kT_ref, o_ref):
    # x_ref:  (B*C+1, H*W)   activations with a trailing ones-row (bias fold)
    # w_ref:  (B*nc, B*C+1)  kron(I_B, conv_weight) with bias column appended
    # kT_ref: (H*W, Ntile)   slice of kron(A_h, A_w)^T  (bf16 by default)
    # o_ref:  (B*nc, Ntile)  lane-dense flat output tile (Ntile % 128 == 0)
    logits = jnp.dot(w_ref[...], x_ref[...],
                     preferred_element_type=jnp.float32)                # (B*nc, H*W)
    o_ref[...] = jnp.dot(logits.astype(kT_ref.dtype), kT_ref[...],
                         preferred_element_type=jnp.float32)            # (B*nc, Ntile)


@partial(jax.jit, static_argnames=("tokenH", "tokenW", "interp_dtype", "n_splits"))
def linear_classifier_token(x, weight, bias, *, tokenH: int, tokenW: int,
                            interp_dtype=jnp.bfloat16, n_splits: int = 2):
    """x: (..., C, tokenH, tokenW) float32. Returns (B, nc, 14*H, 14*W) float32."""
    nc, C = weight.shape
    H, W = tokenH, tokenW
    x = x.reshape(-1, C, H, W).astype(jnp.float32)   # mirrors torch reshape(-1, C, H, W)
    B = x.shape[0]
    Hout, Wout = 14 * H, 14 * W
    HW, HWout = H * W, Hout * Wout

    # --- 1x1 conv for the whole batch as one matmul: kron(I_B, w) @ x_flat (+ bias) ---
    x_flat = x.reshape(B * C, HW)
    x_aug = jnp.concatenate([x_flat, jnp.ones((1, HW), jnp.float32)], axis=0)     # (B*C+1, HW)
    w_big = jnp.kron(jnp.eye(B, dtype=jnp.float32), weight.astype(jnp.float32))   # (B*nc, B*C)
    b_big = jnp.tile(bias.astype(jnp.float32).reshape(nc, 1), (B, 1))             # (B*nc, 1)
    w_aug = jnp.concatenate([w_big, b_big], axis=1)                               # (B*nc, B*C+1)

    # --- bilinear upsample as one matmul: out = logits @ kron(A_h, A_w)^T ---
    A_h = _interp_matrix(H, Hout)                     # (Hout, H)
    A_w = _interp_matrix(W, Wout)                     # (Wout, W)
    kT = jnp.kron(A_h.T, A_w.T).astype(interp_dtype)  # (HW, HWout), ~1.6 MB bf16 at H=W=8
    # NOTE(perf): the dense Kron matrix is only viable for small H*W. For large
    # tokens / large nc, switch to the separable two-matmul form, tile the output
    # over Hout (or nc), and set vmem_limit_bytes explicitly (v7x has 64 MiB VMEM).

    # Output N-split keeps both v7x TensorCores busy; negligible cost on 1-TC chips.
    if HWout % (n_splits * 128) != 0:
        n_splits = 1
    n_tile = HWout // n_splits

    out_flat = pl.pallas_call(
        _kernel,
        out_shape=jax.ShapeDtypeStruct((B * nc, HWout), jnp.float32),
        grid_spec=pltpu.PrefetchScalarGridSpec(
            num_scalar_prefetch=0,
            grid=(n_splits,),
            in_specs=[
                pl.BlockSpec((B * C + 1, HW), lambda n: (0, 0)),
                pl.BlockSpec((B * nc, B * C + 1), lambda n: (0, 0)),
                pl.BlockSpec((HW, n_tile), lambda n: (0, n)),
            ],
            out_specs=pl.BlockSpec((B * nc, n_tile), lambda n: (0, n)),
        ),
        compiler_params=pltpu.CompilerParams(
            dimension_semantics=("parallel",)),
    )(x_aug, w_aug, kT)

    # Contiguous row-major reshape back to NCHW (free).
    return out_flat.reshape(B, nc, Hout, Wout)


def _reference(x, weight, bias, tokenH, tokenW):
    """Pure-JAX reference: conv1x1 + bilinear (align_corners=False)."""
    C = weight.shape[1]
    x = x.reshape(-1, C, tokenH, tokenW).astype(jnp.float32)
    logits = jnp.einsum('ok,bkhw->bohw', weight.astype(jnp.float32), x) \
        + bias.astype(jnp.float32)[None, :, None, None]
    A_h = _interp_matrix(tokenH, tokenH * 14)
    A_w = _interp_matrix(tokenW, tokenW * 14)
    return jnp.einsum('Hh,bchw,Ww->bcHW', A_h, logits, A_w)


if __name__ == "__main__":
    # Small shapes consistent with the module: B=2, in_channels=32, nc=2,
    # tokenH=tokenW=8  ->  output (2, 2, 112, 112).
    B, C, nc, H, W = 2, 32, 2, 8, 8
    key = jax.random.PRNGKey(0)
    kx, kw, kb = jax.random.split(key, 3)
    x = jax.random.normal(kx, (B, C, H, W), jnp.float32)          # NCHW input
    weight = jax.random.normal(kw, (nc, C), jnp.float32) * 0.05   # Conv2d(C, nc, (1,1)) weight
    bias = jax.random.normal(kb, (nc,), jnp.float32) * 0.05

    out = linear_classifier_token(x, weight, bias, tokenH=H, tokenW=W)
    out = jax.block_until_ready(out)

    assert out.shape == (B, nc, H * 14, W * 14)
    assert bool(jnp.all(jnp.isfinite(out)))
    ref = _reference(x, weight, bias, H, W)
    # bf16 interpolation operands with f32 accumulation -> loose tolerance.
    assert bool(jnp.allclose(out, ref, atol=2e-2, rtol=2e-2))
    print("KERNEL_OK")
</pallas_src>

<mosaic_0001>
module attributes {stable_mosaic.version = 11 : i64} {
  func.func private @main(%arg0: i32) attributes {dimension_semantics = [#tpu.dimension_semantics<core_parallel>], iteration_bounds = array<i64: 2>, tpu.core_type = #tpu.core_type<sc_scalar_subcore>, window_params = []} {
    return
  }
}

module attributes {stable_mosaic.version = 11 : i64} {
  func.func private @main(%arg0: i32) attributes {dimension_semantics = [#tpu.dimension_semantics<core_parallel>], iteration_bounds = array<i64: 2>, tpu.core_type = #tpu.core_type<sc_scalar_subcore>, window_params = []} {
    return
  }
}

module attributes {stable_mosaic.version = 11 : i64} {
  func.func @_kernel(%arg0: i32, %arg1: memref<65x64xf32, #tpu.memory_space<vmem>>, %arg2: memref<4x65xf32, #tpu.memory_space<vmem>>, %arg3: memref<64x6272xbf16, #tpu.memory_space<vmem>>, %arg4: memref<4x6272xf32, #tpu.memory_space<vmem>>) attributes {dimension_semantics = [#tpu.dimension_semantics<parallel>], iteration_bounds = array<i64: 2>, scalar_prefetch = 0 : i64, scratch_operands = 0 : i64, tpu.core_type = #tpu.core_type<tc>, window_params = [{pipeline_mode = #tpu.pipeline_mode<synchronous>, transform_indices = @transform_0, window_bounds = array<i64: 65, 64>}, {pipeline_mode = #tpu.pipeline_mode<synchronous>, transform_indices = @transform_1, window_bounds = array<i64: 4, 65>}, {transform_indices = @transform_2, window_bounds = array<i64: 64, 6272>}, {transform_indices = @transform_3, window_bounds = array<i64: 4, 6272>}]} {
    %c0 = arith.constant 0 : index
    %c0_0 = arith.constant 0 : index
    %0 = vector.load %arg2[%c0, %c0_0] : memref<4x65xf32, #tpu.memory_space<vmem>>, vector<4x65xf32>
    %c0_1 = arith.constant 0 : index
    %c0_2 = arith.constant 0 : index
    %1 = vector.load %arg1[%c0_1, %c0_2] : memref<65x64xf32, #tpu.memory_space<vmem>>, vector<65x64xf32>
    %cst = arith.constant dense<0.000000e+00> : vector<4x64xf32>
    %2 = tpu.matmul %0, %1, %cst {dimension_numbers = #tpu.dot_dimension_numbers<[1], [0], [0], [1], [0, 0, 1, 1], [], []>} : vector<4x65xf32>, vector<65x64xf32>, vector<4x64xf32> -> vector<4x64xf32>
    %3 = arith.truncf %2 : vector<4x64xf32> to vector<4x64xbf16>
    %c0_3 = arith.constant 0 : index
    %c0_4 = arith.constant 0 : index
    %4 = vector.load %arg3[%c0_3, %c0_4] : memref<64x6272xbf16, #tpu.memory_space<vmem>>, vector<64x6272xbf16>
    %cst_5 = arith.constant dense<0.000000e+00> : vector<4x6272xf32>
    %5 = tpu.matmul %3, %4, %cst_5 {dimension_numbers = #tpu.dot_dimension_numbers<[1], [0], [0], [1], [0, 0, 1, 1], [], []>} : vector<4x64xbf16>, vector<64x6272xbf16>, vector<4x6272xf32> -> vector<4x6272xf32>
    %c0_6 = arith.constant 0 : index
    %c0_7 = arith.constant 0 : index
    %6 = vector.load %arg4[%c0_6, %c0_7] : memref<4x6272xf32, #tpu.memory_space<vmem>>, vector<4x6272xf32>
    tpu.vector_store %arg4[%c0_6, %c0_7], %5 {strides = array<i32>} : memref<4x6272xf32, #tpu.memory_space<vmem>>, vector<4x6272xf32>,
    return
  }
  func.func @transform_0(%arg0: i32) -> (i32, i32) {
    %c0_i32 = arith.constant 0 : i32
    %c0_i32_0 = arith.constant 0 : i32
    %c0_i32_1 = arith.constant 0 : i32
    return %c0_i32, %c0_i32_0 : i32, i32
  }
  func.func @transform_1(%arg0: i32) -> (i32, i32) {
    %c0_i32 = arith.constant 0 : i32
    %c0_i32_0 = arith.constant 0 : i32
    %c0_i32_1 = arith.constant 0 : i32
    return %c0_i32, %c0_i32_0 : i32, i32
  }
  func.func @transform_2(%arg0: i32) -> (i32, i32) {
    %c0_i32 = arith.constant 0 : i32
    %c0_i32_0 = arith.constant 0 : i32
    return %c0_i32, %arg0 : i32, i32
  }
  func.func @transform_3(%arg0: i32) -> (i32, i32) {
    %c0_i32 = arith.constant 0 : i32
    %c0_i32_0 = arith.constant 0 : i32
    return %c0_i32, %arg0 : i32, i32
  }
}

</mosaic_0001>

<bundles_post_ra>
// kernel: linear_classifier_token.1
= control target key start
LH: loop header
LB: loop body
LE: loop exit
PB: predicated region body
PF: predicated region fallthrough
CT: control target
= control target key end

     0   :  { %s3755_s12 = smov 0   ;;  %s3757_s13 = smov 0   ;;  %s4559_s0 = inlined_call_operand.vmem [shape: f32[65,64], index: 0, kind: input, shape index: {}]   ;;  %s4560_s1 = inlined_call_operand.vmem [shape: f32[4,65], index: 1, kind: input, shape index: {}]   ;;  %s4561_s2 = inlined_call_operand.vmem [shape: bf16[64,12544], index: 2, kind: input, shape index: {}]   ;;  %s4562_s3 = inlined_call_operand.vmem [shape: f32[4,12544], index: 3, kind: output, shape index: {}]  }
   0x1   :  { %s3759_s14 = smov 0  }
   0x2 LB: > { %s3090_s15 = sadd.s32 4294967295, %s3730_s14   ;;  %s3772_s16 = sadd.s32 1, %s3730_s14   ;;  %s3730_s14 = sphi %s3759_s14, %s4565_s14   ;;  %s3726_s13 = sphi %s3757_s13, %s4564_s13   ;;  %s3722_s12 = sphi %s3755_s12, %s4563_s12  }
   0x3   : > { %s59_s17 = ssub.s32 %s3730_s14, %s3772_s16  ;;  %s62_s18 = sadd.s32 1, %s3726_s13 }
   0x4   : > { %p60_p0 = scmp.eq.s32.totalorder %s59_s17, 0  ;;  %p69_p1 = scmp.ne.s32.totalorder %s3726_s13, %s3722_s12 }
   0x5   : > { %p70_p2 = scmp.eq.s32.totalorder %s3730_s14, 0  ;;  %p3093_p4 = scmp.ge.s32.totalorder %s3730_s14, 2 }
   0x6   : > { %s3781_s19 = scalar_select %p60_p0, %s3726_s13, %s62_s18  }
   0x7   : > { %p71_p3 = por %p70_p2, %p69_p1  ;;  %127 = sbr.rel (%p3093_p4) target bundleno = 118 (0x76), region = 24 }
   0xc   : > { %130 = sbr.rel (!%p71_p3) target bundleno = 118 (0x76), region = 28  ;;  %s132_s20 = sand.u32 (%p71_p3), 1, %s3726_s13  }
   0xd   : > { %s3338_s21 = smul.u32 (%p71_p3), 196, %s3730_s14 }
   0xe   : > { %s3387_s22 = smul.u32 (%p71_p3), 1568, %s132_s20 }
   0xf   : > { %s3789_s25 = scalar_lea.vmem (%p71_p3), %s4561_s2, %s3338_s21 }
  0x10   : > { %v152_v0 = vld [vmem:[%s3789_s25] sm:$0xff] (%p71_p3)  ;;  %v154_v1 = vld [vmem:[%s3789_s25 + $0x8] sm:$0xff] (%p71_p3)  ;;  %v156_v2 = vld [vmem:[%s3789_s25 + $0x10] sm:$0xff] (%p71_p3)  ;;  %s3794_s26 = scalar_lea.vmem (%p71_p3), [#allocation2], %s3387_s22 }
  0x11   : > { %153 = vst [vmem:[%s3794_s26] sm:$0xff] %v152_v0  ;;  %155 = vst [vmem:[%s3794_s26 + $0x8] sm:$0xff] %v154_v1  ;;  %v158_v3 = vld [vmem:[%s3789_s25 + $0x18] sm:$0xff]  ;;  %v160_v4 = vld [vmem:[%s3789_s25 + $0x20] sm:$0xff] }
  0x12   : > { %157 = vst [vmem:[%s3794_s26 + $0x10] sm:$0xff] %v156_v2  ;;  %v162_v5 = vld [vmem:[%s3789_s25 + $0x28] sm:$0xff]  ;;  %159 = vst [vmem:[%s3794_s26 + $0x18] sm:$0xff] %v158_v3  ;;  %v164_v6 = vld [vmem:[%s3789_s25 + $0x30] sm:$0xff] }
  0x13   : > { %161 = vst [vmem:[%s3794_s26 + $0x20] sm:$0xff] %v160_v4  ;;  %163 = vst [vmem:[%s3794_s26 + $0x28] sm:$0xff] %v162_v5  ;;  %v166_v7 = vld [vmem:[%s3789_s25 + $0x38] sm:$0xff]  ;;  %v168_v8 = vld [vmem:[%s3789_s25 + $0x40] sm:$0xff] }
  0x14   : > { %165 = vst [vmem:[%s3794_s26 + $0x30] sm:$0xff] %v164_v6  ;;  %167 = vst [vmem:[%s3794_s26 + $0x38] sm:$0xff] %v166_v7  ;;  %v170_v9 = vld [vmem:[%s3789_s25 + $0x48] sm:$0xff]  ;;  %v172_v10 = vld [vmem:[%s3789_s25 + $0x50] sm:$0xff] }
  0x15   : > { %169 = vst [vmem:[%s3794_s26 + $0x40] sm:$0xff] %v168_v8  ;;  %v174_v11 = vld [vmem:[%s3789_s25 + $0x58] sm:$0xff]  ;;  %171 = vst [vmem:[%s3794_s26 + $0x48] sm:$0xff] %v170_v9  ;;  %v176_v12 = vld [vmem:[%s3789_s25 + $0x60] sm:$0xff] }
  0x16   : > { %173 = vst [vmem:[%s3794_s26 + $0x50] sm:$0xff] %v172_v10  ;;  %175 = vst [vmem:[%s3794_s26 + $0x58] sm:$0xff] %v174_v11  ;;  %v178_v13 = vld [vmem:[%s3789_s25 + $0x68] sm:$0xff]  ;;  %v180_v14 = vld [vmem:[%s3789_s25 + $0x70] sm:$0xff] }
  0x17   : > { %177 = vst [vmem:[%s3794_s26 + $0x60] sm:$0xff] %v176_v12  ;;  %179 = vst [vmem:[%s3794_s26 + $0x68] sm:$0xff] %v178_v13  ;;  %v182_v15 = vld [vmem:[%s3789_s25 + $0x78] sm:$0xff]  ;;  %v184_v16 = vld [vmem:[%s3789_s25 + $0x80] sm:$0xff] }
  0x18   : > { %181 = vst [vmem:[%s3794_s26 + $0x70] sm:$0xff] %v180_v14  ;;  %v186_v17 = vld [vmem:[%s3789_s25 + $0x88] sm:$0xff]  ;;  %183 = vst [vmem:[%s3794_s26 + $0x78] sm:$0xff] %v182_v15  ;;  %v188_v18 = vld [vmem:[%s3789_s25 + $0x90] sm:$0xff] }
  0x19   : > { %185 = vst [vmem:[%s3794_s26 + $0x80] sm:$0xff] %v184_v16  ;;  %187 = vst [vmem:[%s3794_s26 + $0x88] sm:$0xff] %v186_v17  ;;  %v190_v19 = vld [vmem:[%s3789_s25 + $0x98] sm:$0xff]  ;;  %v192_v20 = vld [vmem:[%s3789_s25 + $0xa0] sm:$0xff] }
  0x1a   : > { %189 = vst [vmem:[%s3794_s26 + $0x90] sm:$0xff] %v188_v18  ;;  %191 = vst [vmem:[%s3794_s26 + $0x98] sm:$0xff] %v190_v19  ;;  %v194_v21 = vld [vmem:[%s3789_s25 + $0xa8] sm:$0xff]  ;;  %v196_v22 = vld [vmem:[%s3789_s25 + $0xb0] sm:$0xff] }
  0x1b   : > { %193 = vst [vmem:[%s3794_s26 + $0xa0] sm:$0xff] %v192_v20  ;;  %v198_v23 = vld [vmem:[%s3789_s25 + $0xb8] sm:$0xff]  ;;  %195 = vst [vmem:[%s3794_s26 + $0xa8] sm:$0xff] %v194_v21  ;;  %v200_v24 = vld [vmem:[%s3789_s25 + $0x188] sm:$0xff] }
  0x1c   : > { %197 = vst [vmem:[%s3794_s26 + $0xb0] sm:$0xff] %v196_v22  ;;  %199 = vst [vmem:[%s3794_s26 + $0xb8] sm:$0xff] %v198_v23  ;;  %v202_v25 = vld [vmem:[%s3789_s25 + $0x190] sm:$0xff]  ;;  %v204_v26 = vld [vmem:[%s3789_s25 + $0x198] sm:$0xff] }
  0x1d   : > { %201 = vst [vmem:[%s3794_s26 + $0xc4] sm:$0xff] %v200_v24  ;;  %203 = vst [vmem:[%s3794_s26 + $0xcc] sm:$0xff] %v202_v25  ;;  %v206_v27 = vld [vmem:[%s3789_s25 + $0x1a0] sm:$0xff]  ;;  %v208_v28 = vld [vmem:[%s3789_s25 + $0x1a8] sm:$0xff] }
  0x1e   : > { %205 = vst [vmem:[%s3794_s26 + $0xd4] sm:$0xff] %v204_v26  ;;  %v210_v29 = vld [vmem:[%s3789_s25 + $0x1b0] sm:$0xff]  ;;  %207 = vst [vmem:[%s3794_s26 + $0xdc] sm:$0xff] %v206_v27  ;;  %v212_v30 = vld [vmem:[%s3789_s25 + $0x1b8] sm:$0xff] }
  0x1f   : > { %209 = vst [vmem:[%s3794_s26 + $0xe4] sm:$0xff] %v208_v28  ;;  %211 = vst [vmem:[%s3794_s26 + $0xec] sm:$0xff] %v210_v29  ;;  %v214_v31 = vld [vmem:[%s3789_s25 + $0x1c0] sm:$0xff]  ;;  %v216_v32 = vld [vmem:[%s3789_s25 + $0x1c8] sm:$0xff] }
  0x20   : > { %213 = vst [vmem:[%s3794_s26 + $0xf4] sm:$0xff] %v212_v30  ;;  %215 = vst [vmem:[%s3794_s26 + $0xfc] sm:$0xff] %v214_v31  ;;  %v218_v33 = vld [vmem:[%s3789_s25 + $0x1d0] sm:$0xff]  ;;  %v220_v34 = vld [vmem:[%s3789_s25 + $0x1d8] sm:$0xff] }
  0x21   : > { %217 = vst [vmem:[%s3794_s26 + $0x104] sm:$0xff] %v216_v32  ;;  %v222_v35 = vld [vmem:[%s3789_s25 + $0x1e0] sm:$0xff]  ;;  %219 = vst [vmem:[%s3794_s26 + $0x10c] sm:$0xff] %v218_v33  ;;  %v224_v36 = vld [vmem:[%s3789_s25 + $0x1e8] sm:$0xff] }
  0x22   : > { %221 = vst [vmem:[%s3794_s26 + $0x114] sm:$0xff] %v220_v34  ;;  %223 = vst [vmem:[%s3794_s26 + $0x11c] sm:$0xff] %v222_v35  ;;  %v226_v37 = vld [vmem:[%s3789_s25 + $0x1f0] sm:$0xff]  ;;  %v228_v38 = vld [vmem:[%s3789_s25 + $0x1f8] sm:$0xff] }
  0x23   : > { %225 = vst [vmem:[%s3794_s26 + $0x124] sm:$0xff] %v224_v36  ;;  %227 = vst [vmem:[%s3794_s26 + $0x12c] sm:$0xff] %v226_v37  ;;  %v230_v39 = vld [vmem:[%s3789_s25 + $0x200] sm:$0xff]  ;;  %v232_v40 = vld [vmem:[%s3789_s25 + $0x208] sm:$0xff] }
  0x24   : > { %229 = vst [vmem:[%s3794_s26 + $0x134] sm:$0xff] %v228_v38  ;;  %v234_v41 = vld [vmem:[%s3789_s25 + $0x210] sm:$0xff]  ;;  %231 = vst [vmem:[%s3794_s26 + $0x13c] sm:$0xff] %v230_v39  ;;  %v236_v42 = vld [vmem:[%s3789_s25 + $0x218] sm:$0xff] }
  0x25   : > { %233 = vst [vmem:[%s3794_s26 + $0x144] sm:$0xff] %v232_v40  ;;  %235 = vst [vmem:[%s3794_s26 + $0x14c] sm:$0xff] %v234_v41  ;;  %v238_v43 = vld [vmem:[%s3789_s25 + $0x220] sm:$0xff]  ;;  %v240_v44 = vld [vmem:[%s3789_s25 + $0x228] sm:$0xff] }
  0x26   : > { %237 = vst [vmem:[%s3794_s26 + $0x154] sm:$0xff] %v236_v42  ;;  %239 = vst [vmem:[%s3794_s26 + $0x15c] sm:$0xff] %v238_v43  ;;  %v242_v45 = vld [vmem:[%s3789_s25 + $0x230] sm:$0xff]  ;;  %v244_v46 = vld [vmem:[%s3789_s25 + $0x238] sm:$0xff] }
  0x27   : > { %241 = vst [vmem:[%s3794_s26 + $0x164] sm:$0xff] %v240_v44  ;;  %v246_v47 = vld [vmem:[%s3789_s25 + $0x240] sm:$0xff]  ;;  %243 = vst [vmem:[%s3794_s26 + $0x16c] sm:$0xff] %v242_v45  ;;  %v248_v48 = vld [vmem:[%s3789_s25 + $0x310] sm:$0xff] }
  0x28   : > { %245 = vst [vmem:[%s3794_s26 + $0x174] sm:$0xff] %v244_v46  ;;  %247 = vst [vmem:[%s3794_s26 + $0x17c] sm:$0xff] %v246_v47  ;;  %v250_v49 = vld [vmem:[%s3789_s25 + $0x318] sm:$0xff]  ;;  %v252_v50 = vld [vmem:[%s3789_s25 + $0x320] sm:$0xff] }
  0x29   : > { %249 = vst [vmem:[%s3794_s26 + $0x188] sm:$0xff] %v248_v48  ;;  %251 = vst [vmem:[%s3794_s26 + $0x190] sm:$0xff] %v250_v49  ;;  %v254_v51 = vld [vmem:[%s3789_s25 + $0x328] sm:$0xff]  ;;  %v256_v52 = vld [vmem:[%s3789_s25 + $0x330] sm:$0xff] }
  0x2a   : > { %253 = vst [vmem:[%s3794_s26 + $0x198] sm:$0xff] %v252_v50  ;;  %v258_v53 = vld [vmem:[%s3789_s25 + $0x338] sm:$0xff]  ;;  %255 = vst [vmem:[%s3794_s26 + $0x1a0] sm:$0xff] %v254_v51  ;;  %v260_v54 = vld [vmem:[%s3789_s25 + $0x340] sm:$0xff] }
  0x2b   : > { %257 = vst [vmem:[%s3794_s26 + $0x1a8] sm:$0xff] %v256_v52  ;;  %259 = vst [vmem:[%s3794_s26 + $0x1b0] sm:$0xff] %v258_v53  ;;  %v262_v55 = vld [vmem:[%s3789_s25 + $0x348] sm:$0xff]  ;;  %v264_v56 = vld [vmem:[%s3789_s25 + $0x350] sm:$0xff] }
  0x2c   : > { %261 = vst [vmem:[%s3794_s26 + $0x1b8] sm:$0xff] %v260_v54  ;;  %263 = vst [vmem:[%s3794_s26 + $0x1c0] sm:$0xff] %v262_v55  ;;  %v266_v57 = vld [vmem:[%s3789_s25 + $0x358] sm:$0xff]  ;;  %v268_v58 = vld [vmem:[%s3789_s25 + $0x360] sm:$0xff] }
  0x2d   : > { %265 = vst [vmem:[%s3794_s26 + $0x1c8] sm:$0xff] %v264_v56  ;;  %v270_v59 = vld [vmem:[%s3789_s25 + $0x368] sm:$0xff]  ;;  %267 = vst [vmem:[%s3794_s26 + $0x1d0] sm:$0xff] %v266_v57  ;;  %v272_v60 = vld [vmem:[%s3789_s25 + $0x370] sm:$0xff] }
  0x2e   : > { %269 = vst [vmem:[%s3794_s26 + $0x1d8] sm:$0xff] %v268_v58  ;;  %271 = vst [vmem:[%s3794_s26 + $0x1e0] sm:$0xff] %v270_v59  ;;  %v274_v61 = vld [vmem:[%s3789_s25 + $0x378] sm:$0xff]  ;;  %v276_v62 = vld [vmem:[%s3789_s25 + $0x380] sm:$0xff] }
  0x2f   : > { %273 = vst [vmem:[%s3794_s26 + $0x1e8] sm:$0xff] %v272_v60  ;;  %275 = vst [vmem:[%s3794_s26 + $0x1f0] sm:$0xff] %v274_v61  ;;  %v278_v63 = vld [vmem:[%s3789_s25 + $0x388] sm:$0xff]  ;;  %v280_v0 = vld [vmem:[%s3789_s25 + $0x390] sm:$0xff] }
  0x30   : > { %277 = vst [vmem:[%s3794_s26 + $0x1f8] sm:$0xff] %v276_v62  ;;  %v282_v1 = vld [vmem:[%s3789_s25 + $0x398] sm:$0xff]  ;;  %279 = vst [vmem:[%s3794_s26 + $0x200] sm:$0xff] %v278_v63  ;;  %v284_v2 = vld [vmem:[%s3789_s25 + $0x3a0] sm:$0xff] }
  0x31   : > { %281 = vst [vmem:[%s3794_s26 + $0x208] sm:$0xff] %v280_v0  ;;  %283 = vst [vmem:[%s3794_s26 + $0x210] sm:$0xff] %v282_v1  ;;  %v286_v3 = vld [vmem:[%s3789_s25 + $0x3a8] sm:$0xff]  ;;  %v288_v4 = vld [vmem:[%s3789_s25 + $0x3b0] sm:$0xff] }
  0x32   : > { %285 = vst [vmem:[%s3794_s26 + $0x218] sm:$0xff] %v284_v2  ;;  %287 = vst [vmem:[%s3794_s26 + $0x220] sm:$0xff] %v286_v3  ;;  %v290_v5 = vld [vmem:[%s3789_s25 + $0x3b8] sm:$0xff]  ;;  %v292_v6 = vld [vmem:[%s3789_s25 + $0x3c0] sm:$0xff] }
  0x33   : > { %289 = vst [vmem:[%s3794_s26 + $0x228] sm:$0xff] %v288_v4  ;;  %v294_v7 = vld [vmem:[%s3789_s25 + $0x3c8] sm:$0xff]  ;;  %291 = vst [vmem:[%s3794_s26 + $0x230] sm:$0xff] %v290_v5  ;;  %v296_v8 = vld [vmem:[%s3789_s25 + $0x498] sm:$0xff] }
  0x34   : > { %293 = vst [vmem:[%s3794_s26 + $0x238] sm:$0xff] %v292_v6  ;;  %295 = vst [vmem:[%s3794_s26 + $0x240] sm:$0xff] %v294_v7  ;;  %v298_v9 = vld [vmem:[%s3789_s25 + $0x4a0] sm:$0xff]  ;;  %v300_v10 = vld [vmem:[%s3789_s25 + $0x4a8] sm:$0xff] }
  0x35   : > { %297 = vst [vmem:[%s3794_s26 + $0x24c] sm:$0xff] %v296_v8  ;;  %299 = vst [vmem:[%s3794_s26 + $0x254] sm:$0xff] %v298_v9  ;;  %v302_v11 = vld [vmem:[%s3789_s25 + $0x4b0] sm:$0xff]  ;;  %v304_v12 = vld [vmem:[%s3789_s25 + $0x4b8] sm:$0xff] }
  0x36   : > { %301 = vst [vmem:[%s3794_s26 + $0x25c] sm:$0xff] %v300_v10  ;;  %v306_v13 = vld [vmem:[%s3789_s25 + $0x4c0] sm:$0xff]  ;;  %303 = vst [vmem:[%s3794_s26 + $0x264] sm:$0xff] %v302_v11  ;;  %v308_v14 = vld [vmem:[%s3789_s25 + $0x4c8] sm:$0xff] }
  0x37   : > { %305 = vst [vmem:[%s3794_s26 + $0x26c] sm:$0xff] %v304_v12  ;;  %307 = vst [vmem:[%s3794_s26 + $0x274] sm:$0xff] %v306_v13  ;;  %v310_v15 = vld [vmem:[%s3789_s25 + $0x4d0] sm:$0xff]  ;;  %v312_v16 = vld [vmem:[%s3789_s25 + $0x4d8] sm:$0xff] }
  0x38   : > { %309 = vst [vmem:[%s3794_s26 + $0x27c] sm:$0xff] %v308_v14  ;;  %311 = vst [vmem:[%s3794_s26 + $0x284] sm:$0xff] %v310_v15  ;;  %v314_v17 = vld [vmem:[%s3789_s25 + $0x4e0] sm:$0xff]  ;;  %v316_v18 = vld [vmem:[%s3789_s25 + $0x4e8] sm:$0xff] }
  0x39   : > { %313 = vst [vmem:[%s3794_s26 + $0x28c] sm:$0xff] %v312_v16  ;;  %v318_v19 = vld [vmem:[%s3789_s25 + $0x4f0] sm:$0xff]  ;;  %315 = vst [vmem:[%s3794_s26 + $0x294] sm:$0xff] %v314_v17  ;;  %v320_v20 = vld [vmem:[%s3789_s25 + $0x4f8] sm:$0xff] }
  0x3a   : > { %317 = vst [vmem:[%s3794_s26 + $0x29c] sm:$0xff] %v316_v18  ;;  %319 = vst [vmem:[%s3794_s26 + $0x2a4] sm:$0xff] %v318_v19  ;;  %v322_v21 = vld [vmem:[%s3789_s25 + $0x500] sm:$0xff]  ;;  %v324_v22 = vld [vmem:[%s3789_s25 + $0x508] sm:$0xff] }
  0x3b   : > { %321 = vst [vmem:[%s3794_s26 + $0x2ac] sm:$0xff] %v320_v20  ;;  %323 = vst [vmem:[%s3794_s26 + $0x2b4] sm:$0xff] %v322_v21  ;;  %v326_v23 = vld [vmem:[%s3789_s25 + $0x510] sm:$0xff]  ;;  %v328_v24 = vld [vmem:[%s3789_s25 + $0x518] sm:$0xff] }
  0x3c   : > { %325 = vst [vmem:[%s3794_s26 + $0x2bc] sm:$0xff] %v324_v22  ;;  %v330_v25 = vld [vmem:[%s3789_s25 + $0x520] sm:$0xff]  ;;  %327 = vst [vmem:[%s3794_s26 + $0x2c4] sm:$0xff] %v326_v23  ;;  %v332_v26 = vld [vmem:[%s3789_s25 + $0x528] sm:$0xff] }
  0x3d   : > { %329 = vst [vmem:[%s3794_s26 + $0x2cc] sm:$0xff] %v328_v24  ;;  %331 = vst [vmem:[%s3794_s26 + $0x2d4] sm:$0xff] %v330_v25  ;;  %v334_v27 = vld [vmem:[%s3789_s25 + $0x530] sm:$0xff]  ;;  %v336_v28 = vld [vmem:[%s3789_s25 + $0x538] sm:$0xff] }
  0x3e   : > { %333 = vst [vmem:[%s3794_s26 + $0x2dc] sm:$0xff] %v332_v26  ;;  %335 = vst [vmem:[%s3794_s26 + $0x2e4] sm:$0xff] %v334_v27  ;;  %v338_v29 = vld [vmem:[%s3789_s25 + $0x540] sm:$0xff]  ;;  %v340_v30 = vld [vmem:[%s3789_s25 + $0x548] sm:$0xff] }
  0x3f   : > { %337 = vst [vmem:[%s3794_s26 + $0x2ec] sm:$0xff] %v336_v28  ;;  %v342_v31 = vld [vmem:[%s3789_s25 + $0x550] sm:$0xff]  ;;  %339 = vst [vmem:[%s3794_s26 + $0x2f4] sm:$0xff] %v338_v29  ;;  %v344_v32 = vld [vmem:[%s3789_s25 + $0x620] sm:$0xff] }
  0x40   : > { %341 = vst [vmem:[%s3794_s26 + $0x2fc] sm:$0xff] %v340_v30  ;;  %343 = vst [vmem:[%s3794_s26 + $0x304] sm:$0xff] %v342_v31  ;;  %v346_v33 = vld [vmem:[%s3789_s25 + $0x628] sm:$0xff]  ;;  %v348_v34 = vld [vmem:[%s3789_s25 + $0x630] sm:$0xff] }
  0x41   : > { %345 = vst [vmem:[%s3794_s26 + $0x310] sm:$0xff] %v344_v32  ;;  %347 = vst [vmem:[%s3794_s26 + $0x318] sm:$0xff] %v346_v33  ;;  %v350_v35 = vld [vmem:[%s3789_s25 + $0x638] sm:$0xff]  ;;  %v352_v36 = vld [vmem:[%s3789_s25 + $0x640] sm:$0xff] }
  0x42   : > { %349 = vst [vmem:[%s3794_s26 + $0x320] sm:$0xff] %v348_v34  ;;  %v354_v37 = vld [vmem:[%s3789_s25 + $0x648] sm:$0xff]  ;;  %351 = vst [vmem:[%s3794_s26 + $0x328] sm:$0xff] %v350_v35  ;;  %v356_v38 = vld [vmem:[%s3789_s25 + $0x650] sm:$0xff] }
  0x43   : > { %353 = vst [vmem:[%s3794_s26 + $0x330] sm:$0xff] %v352_v36  ;;  %355 = vst [vmem:[%s3794_s26 + $0x338] sm:$0xff] %v354_v37  ;;  %v358_v39 = vld [vmem:[%s3789_s25 + $0x658] sm:$0xff]  ;;  %v360_v40 = vld [vmem:[%s3789_s25 + $0x660] sm:$0xff] }
  0x44   : > { %357 = vst [vmem:[%s3794_s26 + $0x340] sm:$0xff] %v356_v38  ;;  %359 = vst [vmem:[%s3794_s26 + $0x348] sm:$0xff] %v358_v39  ;;  %v362_v41 = vld [vmem:[%s3789_s25 + $0x668] sm:$0xff]  ;;  %v364_v42 = vld [vmem:[%s3789_s25 + $0x670] sm:$0xff] }
  0x45   : > { %361 = vst [vmem:[%s3794_s26 + $0x350] sm:$0xff] %v360_v40  ;;  %v366_v43 = vld [vmem:[%s3789_s25 + $0x678] sm:$0xff]  ;;  %363 = vst [vmem:[%s3794_s26 + $0x358] sm:$0xff] %v362_v41  ;;  %v368_v44 = vld [vmem:[%s3789_s25 + $0x680] sm:$0xff] }
  0x46   : > { %365 = vst [vmem:[%s3794_s26 + $0x360] sm:$0xff] %v364_v42  ;;  %367 = vst [vmem:[%s3794_s26 + $0x368] sm:$0xff] %v366_v43  ;;  %v370_v45 = vld [vmem:[%s3789_s25 + $0x688] sm:$0xff]  ;;  %v372_v46 = vld [vmem:[%s3789_s25 + $0x690] sm:$0xff] }
  0x47   : > { %369 = vst [vmem:[%s3794_s26 + $0x370] sm:$0xff] %v368_v44  ;;  %371 = vst [vmem:[%s3794_s26 + $0x378] sm:$0xff] %v370_v45  ;;  %v374_v47 = vld [vmem:[%s3789_s25 + $0x698] sm:$0xff]  ;;  %v376_v48 = vld [vmem:[%s3789_s25 + $0x6a0] sm:$0xff] }
  0x48   : > { %373 = vst [vmem:[%s3794_s26 + $0x380] sm:$0xff] %v372_v46  ;;  %v378_v49 = vld [vmem:[%s3789_s25 + $0x6a8] sm:$0xff]  ;;  %375 = vst [vmem:[%s3794_s26 + $0x388] sm:$0xff] %v374_v47  ;;  %v380_v50 = vld [vmem:[%s3789_s25 + $0x6b0] sm:$0xff] }
  0x49   : > { %377 = vst [vmem:[%s3794_s26 + $0x390] sm:$0xff] %v376_v48  ;;  %379 = vst [vmem:[%s3794_s26 + $0x398] sm:$0xff] %v378_v49  ;;  %v382_v51 = vld [vmem:[%s3789_s25 + $0x6b8] sm:$0xff]  ;;  %v384_v52 = vld [vmem:[%s3789_s25 + $0x6c0] sm:$0xff] }
  0x4a   : > { %381 = vst [vmem:[%s3794_s26 + $0x3a0] sm:$0xff] %v380_v50  ;;  %383 = vst [vmem:[%s3794_s26 + $0x3a8] sm:$0xff] %v382_v51  ;;  %v386_v53 = vld [vmem:[%s3789_s25 + $0x6c8] sm:$0xff]  ;;  %v388_v54 = vld [vmem:[%s3789_s25 + $0x6d0] sm:$0xff] }
  0x4b   : > { %385 = vst [vmem:[%s3794_s26 + $0x3b0] sm:$0xff] %v384_v52  ;;  %v390_v55 = vld [vmem:[%s3789_s25 + $0x6d8] sm:$0xff]  ;;  %387 = vst [vmem:[%s3794_s26 + $0x3b8] sm:$0xff] %v386_v53  ;;  %v392_v56 = vld [vmem:[%s3789_s25 + $0x7a8] sm:$0xff] }
  0x4c   : > { %389 = vst [vmem:[%s3794_s26 + $0x3c0] sm:$0xff] %v388_v54  ;;  %391 = vst [vmem:[%s3794_s26 + $0x3c8] sm:$0xff] %v390_v55  ;;  %v394_v57 = vld [vmem:[%s3789_s25 + $0x7b0] sm:$0xff]  ;;  %v396_v58 = vld [vmem:[%s3789_s25 + $0x7b8] sm:$0xff] }
  0x4d   : > { %393 = vst [vmem:[%s3794_s26 + $0x3d4] sm:$0xff] %v392_v56  ;;  %395 = vst [vmem:[%s3794_s26 + $0x3dc] sm:$0xff] %v394_v57  ;;  %v398_v59 = vld [vmem:[%s3789_s25 + $0x7c0] sm:$0xff]  ;;  %v400_v60 = vld [vmem:[%s3789_s25 + $0x7c8] sm:$0xff] }
  0x4e   : > { %397 = vst [vmem:[%s3794_s26 + $0x3e4] sm:$0xff] %v396_v58  ;;  %v402_v61 = vld [vmem:[%s3789_s25 + $0x7d0] sm:$0xff]  ;;  %399 = vst [vmem:[%s3794_s26 + $0x3ec] sm:$0xff] %v398_v59  ;;  %v404_v62 = vld [vmem:[%s3789_s25 + $0x7d8] sm:$0xff] }
  0x4f   : > { %401 = vst [vmem:[%s3794_s26 + $0x3f4] sm:$0xff] %v400_v60  ;;  %403 = vst [vmem:[%s3794_s26 + $0x3fc] sm:$0xff] %v402_v61  ;;  %v406_v63 = vld [vmem:[%s3789_s25 + $0x7e0] sm:$0xff]  ;;  %v408_v0 = vld [vmem:[%s3789_s25 + $0x7e8] sm:$0xff] }
  0x50   : > { %405 = vst [vmem:[%s3794_s26 + $0x404] sm:$0xff] %v404_v62  ;;  %407 = vst [vmem:[%s3794_s26 + $0x40c] sm:$0xff] %v406_v63  ;;  %v410_v1 = vld [vmem:[%s3789_s25 + $0x7f0] sm:$0xff]  ;;  %v412_v2 = vld [vmem:[%s3789_s25 + $0x7f8] sm:$0xff] }
  0x51   : > { %409 = vst [vmem:[%s3794_s26 + $0x414] sm:$0xff] %v408_v0  ;;  %v414_v3 = vld [vmem:[%s3789_s25 + $0x800] sm:$0xff]  ;;  %411 = vst [vmem:[%s3794_s26 + $0x41c] sm:$0xff] %v410_v1  ;;  %v416_v4 = vld [vmem:[%s3789_s25 + $0x808] sm:$0xff] }
  0x52   : > { %413 = vst [vmem:[%s3794_s26 + $0x424] sm:$0xff] %v412_v2  ;;  %415 = vst [vmem:[%s3794_s26 + $0x42c] sm:$0xff] %v414_v3  ;;  %v418_v5 = vld [vmem:[%s3789_s25 + $0x810] sm:$0xff]  ;;  %v420_v6 = vld [vmem:[%s3789_s25 + $0x818] sm:$0xff] }
  0x53   : > { %417 = vst [vmem:[%s3794_s26 + $0x434] sm:$0xff] %v416_v4  ;;  %419 = vst [vmem:[%s3794_s26 + $0x43c] sm:$0xff] %v418_v5  ;;  %v422_v7 = vld [vmem:[%s3789_s25 + $0x820] sm:$0xff]  ;;  %v424_v8 = vld [vmem:[%s3789_s25 + $0x828] sm:$0xff] }
  0x54   : > { %421 = vst [vmem:[%s3794_s26 + $0x444] sm:$0xff] %v420_v6  ;;  %v426_v9 = vld [vmem:[%s3789_s25 + $0x830] sm:$0xff]  ;;  %423 = vst [vmem:[%s3794_s26 + $0x44c] sm:$0xff] %v422_v7  ;;  %v428_v10 = vld [vmem:[%s3789_s25 + $0x838] sm:$0xff] }
  0x55   : > { %425 = vst [vmem:[%s3794_s26 + $0x454] sm:$0xff] %v424_v8  ;;  %427 = vst [vmem:[%s3794_s26 + $0x45c] sm:$0xff] %v426_v9  ;;  %v430_v11 = vld [vmem:[%s3789_s25 + $0x840] sm:$0xff]  ;;  %v432_v12 = vld [vmem:[%s3789_s25 + $0x848] sm:$0xff] }
  0x56   : > { %429 = vst [vmem:[%s3794_s26 + $0x464] sm:$0xff] %v428_v10  ;;  %431 = vst [vmem:[%s3794_s26 + $0x46c] sm:$0xff] %v430_v11  ;;  %v434_v13 = vld [vmem:[%s3789_s25 + $0x850] sm:$0xff]  ;;  %v436_v14 = vld [vmem:[%s3789_s25 + $0x858] sm:$0xff] }
  0x57   : > { %433 = vst [vmem:[%s3794_s26 + $0x474] sm:$0xff] %v432_v12  ;;  %v438_v15 = vld [vmem:[%s3789_s25 + $0x860] sm:$0xff]  ;;  %435 = vst [vmem:[%s3794_s26 + $0x47c] sm:$0xff] %v434_v13  ;;  %v440_v16 = vld [vmem:[%s3789_s25 + $0x930] sm:$0xff] }
  0x58   : > { %437 = vst [vmem:[%s3794_s26 + $0x484] sm:$0xff] %v436_v14  ;;  %439 = vst [vmem:[%s3794_s26 + $0x48c] sm:$0xff] %v438_v15  ;;  %v442_v17 = vld [vmem:[%s3789_s25 + $0x938] sm:$0xff]  ;;  %v444_v18 = vld [vmem:[%s3789_s25 + $0x940] sm:$0xff] }
  0x59   : > { %441 = vst [vmem:[%s3794_s26 + $0x498] sm:$0xff] %v440_v16  ;;  %443 = vst [vmem:[%s3794_s26 + $0x4a0] sm:$0xff] %v442_v17  ;;  %v446_v19 = vld [vmem:[%s3789_s25 + $0x948] sm:$0xff]  ;;  %v448_v20 = vld [vmem:[%s3789_s25 + $0x950] sm:$0xff] }
  0x5a   : > { %445 = vst [vmem:[%s3794_s26 + $0x4a8] sm:$0xff] %v444_v18  ;;  %v450_v21 = vld [vmem:[%s3789_s25 + $0x958] sm:$0xff]  ;;  %447 = vst [vmem:[%s3794_s26 + $0x4b0] sm:$0xff] %v446_v19  ;;  %v452_v22 = vld [vmem:[%s3789_s25 + $0x960] sm:$0xff] }
  0x5b   : > { %449 = vst [vmem:[%s3794_s26 + $0x4b8] sm:$0xff] %v448_v20  ;;  %451 = vst [vmem:[%s3794_s26 + $0x4c0] sm:$0xff] %v450_v21  ;;  %v454_v23 = vld [vmem:[%s3789_s25 + $0x968] sm:$0xff]  ;;  %v456_v24 = vld [vmem:[%s3789_s25 + $0x970] sm:$0xff] }
  0x5c   : > { %453 = vst [vmem:[%s3794_s26 + $0x4c8] sm:$0xff] %v452_v22  ;;  %455 = vst [vmem:[%s3794_s26 + $0x4d0] sm:$0xff] %v454_v23  ;;  %v458_v25 = vld [vmem:[%s3789_s25 + $0x978] sm:$0xff]  ;;  %v460_v26 = vld [vmem:[%s3789_s25 + $0x980] sm:$0xff] }
  0x5d   : > { %457 = vst [vmem:[%s3794_s26 + $0x4d8] sm:$0xff] %v456_v24  ;;  %v462_v27 = vld [vmem:[%s3789_s25 + $0x988] sm:$0xff]  ;;  %459 = vst [vmem:[%s3794_s26 + $0x4e0] sm:$0xff] %v458_v25  ;;  %v464_v28 = vld [vmem:[%s3789_s25 + $0x990] sm:$0xff] }
  0x5e   : > { %461 = vst [vmem:[%s3794_s26 + $0x4e8] sm:$0xff] %v460_v26  ;;  %463 = vst [vmem:[%s3794_s26 + $0x4f0] sm:$0xff] %v462_v27  ;;  %v466_v29 = vld [vmem:[%s3789_s25 + $0x998] sm:$0xff]  ;;  %v468_v30 = vld [vmem:[%s3789_s25 + $0x9a0] sm:$0xff] }
  0x5f   : > { %465 = vst [vmem:[%s3794_s26 + $0x4f8] sm:$0xff] %v464_v28  ;;  %467 = vst [vmem:[%s3794_s26 + $0x500] sm:$0xff] %v466_v29  ;;  %v470_v31 = vld [vmem:[%s3789_s25 + $0x9a8] sm:$0xff]  ;;  %v472_v32 = vld [vmem:[%s3789_s25 + $0x9b0] sm:$0xff] }
  0x60   : > { %469 = vst [vmem:[%s3794_s26 + $0x508] sm:$0xff] %v468_v30  ;;  %v474_v33 = vld [vmem:[%s3789_s25 + $0x9b8] sm:$0xff]  ;;  %471 = vst [vmem:[%s3794_s26 + $0x510] sm:$0xff] %v470_v31  ;;  %v476_v34 = vld [vmem:[%s3789_s25 + $0x9c0] sm:$0xff] }
  0x61   : > { %473 = vst [vmem:[%s3794_s26 + $0x518] sm:$0xff] %v472_v32  ;;  %475 = vst [vmem:[%s3794_s26 + $0x520] sm:$0xff] %v474_v33  ;;  %v478_v35 = vld [vmem:[%s3789_s25 + $0x9c8] sm:$0xff]  ;;  %v480_v36 = vld [vmem:[%s3789_s25 + $0x9d0] sm:$0xff] }
  0x62   : > { %477 = vst [vmem:[%s3794_s26 + $0x528] sm:$0xff] %v476_v34  ;;  %479 = vst [vmem:[%s3794_s26 + $0x530] sm:$0xff] %v478_v35  ;;  %v482_v37 = vld [vmem:[%s3789_s25 + $0x9d8] sm:$0xff]  ;;  %v484_v38 = vld [vmem:[%s3789_s25 + $0x9e0] sm:$0xff] }
  0x63   : > { %481 = vst [vmem:[%s3794_s26 + $0x538] sm:$0xff] %v480_v36  ;;  %v486_v39 = vld [vmem:[%s3789_s25 + $0x9e8] sm:$0xff]  ;;  %483 = vst [vmem:[%s3794_s26 + $0x540] sm:$0xff] %v482_v37  ;;  %v488_v40 = vld [vmem:[%s3789_s25 + $0xab8] sm:$0xff] }
  0x64   : > { %485 = vst [vmem:[%s3794_s26 + $0x548] sm:$0xff] %v484_v38  ;;  %487 = vst [vmem:[%s3794_s26 + $0x550] sm:$0xff] %v486_v39  ;;  %v490_v41 = vld [vmem:[%s3789_s25 + $0xac0] sm:$0xff]  ;;  %v492_v42 = vld [vmem:[%s3789_s25 + $0xac8] sm:$0xff] }
  0x65   : > { %489 = vst [vmem:[%s3794_s26 + $0x55c] sm:$0xff] %v488_v40  ;;  %491 = vst [vmem:[%s3794_s26 + $0x564] sm:$0xff] %v490_v41  ;;  %v494_v43 = vld [vmem:[%s3789_s25 + $0xad0] sm:$0xff]  ;;  %v496_v44 = vld [vmem:[%s3789_s25 + $0xad8] sm:$0xff] }
  0x66   : > { %493 = vst [vmem:[%s3794_s26 + $0x56c] sm:$0xff] %v492_v42  ;;  %v498_v45 = vld [vmem:[%s3789_s25 + $0xae0] sm:$0xff]  ;;  %495 = vst [vmem:[%s3794_s26 + $0x574] sm:$0xff] %v494_v43  ;;  %v500_v46 = vld [vmem:[%s3789_s25 + $0xae8] sm:$0xff] }
  0x67   : > { %497 = vst [vmem:[%s3794_s26 + $0x57c] sm:$0xff] %v496_v44  ;;  %499 = vst [vmem:[%s3794_s26 + $0x584] sm:$0xff] %v498_v45  ;;  %v502_v47 = vld [vmem:[%s3789_s25 + $0xaf0] sm:$0xff]  ;;  %v504_v48 = vld [vmem:[%s3789_s25 + $0xaf8] sm:$0xff] }
  0x68   : > { %501 = vst [vmem:[%s3794_s26 + $0x58c] sm:$0xff] %v500_v46  ;;  %503 = vst [vmem:[%s3794_s26 + $0x594] sm:$0xff] %v502_v47  ;;  %v506_v49 = vld [vmem:[%s3789_s25 + $0xb00] sm:$0xff]  ;;  %v508_v50 = vld [vmem:[%s3789_s25 + $0xb08] sm:$0xff] }
  0x69   : > { %505 = vst [vmem:[%s3794_s26 + $0x59c] sm:$0xff] %v504_v48  ;;  %v510_v51 = vld [vmem:[%s3789_s25 + $0xb10] sm:$0xff]  ;;  %507 = vst [vmem:[%s3794_s26 + $0x5a4] sm:$0xff] %v506_v49  ;;  %v512_v52 = vld [vmem:[%s3789_s25 + $0xb18] sm:$0xff] }
  0x6a   : > { %509 = vst [vmem:[%s3794_s26 + $0x5ac] sm:$0xff] %v508_v50  ;;  %511 = vst [vmem:[%s3794_s26 + $0x5b4] sm:$0xff] %v510_v51  ;;  %v514_v53 = vld [vmem:[%s3789_s25 + $0xb20] sm:$0xff]  ;;  %v516_v54 = vld [vmem:[%s3789_s25 + $0xb28] sm:$0xff] }
  0x6b   : > { %513 = vst [vmem:[%s3794_s26 + $0x5bc] sm:$0xff] %v512_v52  ;;  %515 = vst [vmem:[%s3794_s26 + $0x5c4] sm:$0xff] %v514_v53  ;;  %v518_v55 = vld [vmem:[%s3789_s25 + $0xb30] sm:$0xff]  ;;  %v520_v56 = vld [vmem:[%s3789_s25 + $0xb38] sm:$0xff] }
  0x6c   : > { %517 = vst [vmem:[%s3794_s26 + $0x5cc] sm:$0xff] %v516_v54  ;;  %v522_v57 = vld [vmem:[%s3789_s25 + $0xb40] sm:$0xff]  ;;  %519 = vst [vmem:[%s3794_s26 + $0x5d4] sm:$0xff] %v518_v55  ;;  %v524_v58 = vld [vmem:[%s3789_s25 + $0xb48] sm:$0xff] }
  0x6d   : > { %521 = vst [vmem:[%s3794_s26 + $0x5dc] sm:$0xff] %v520_v56  ;;  %523 = vst [vmem:[%s3794_s26 + $0x5e4] sm:$0xff] %v522_v57  ;;  %v526_v59 = vld [vmem:[%s3789_s25 + $0xb50] sm:$0xff]  ;;  %v528_v60 = vld [vmem:[%s3789_s25 + $0xb58] sm:$0xff] }
  0x6e   : > { %525 = vst [vmem:[%s3794_s26 + $0x5ec] sm:$0xff] %v524_v58  ;;  %527 = vst [vmem:[%s3794_s26 + $0x5f4] sm:$0xff] %v526_v59  ;;  %v530_v61 = vld [vmem:[%s3789_s25 + $0xb60] sm:$0xff]  ;;  %v532_v62 = vld [vmem:[%s3789_s25 + $0xb68] sm:$0xff] }
  0x6f   : > { %529 = vst [vmem:[%s3794_s26 + $0x5fc] sm:$0xff] %v528_v60  ;;  %v534_v63 = vld [vmem:[%s3789_s25 + $0xb70] sm:$0xff]  ;;  %531 = vst [vmem:[%s3794_s26 + $0x604] sm:$0xff] %v530_v61  ;;  %v3095_v0 = vld [vmem:[%s3789_s25 + $0xc0] sm:$0xf] }
  0x70   : > { %533 = vst [vmem:[%s3794_s26 + $0x60c] sm:$0xff] %v532_v62  ;;  %535 = vst [vmem:[%s3794_s26 + $0x614] sm:$0xff] %v534_v63  ;;  %v3097_v1 = vld [vmem:[%s3789_s25 + $0x248] sm:$0xf]  ;;  %v3099_v2 = vld [vmem:[%s3789_s25 + $0x3d0] sm:$0xf] }
  0x71   : > { %3096 = vst [vmem:[%s3794_s26 + $0xc0] sm:$0xf] %v3095_v0  ;;  %3098 = vst [vmem:[%s3794_s26 + $0x184] sm:$0xf] %v3097_v1  ;;  %v3101_v3 = vld [vmem:[%s3789_s25 + $0x558] sm:$0xf] }
  0x72   : > { %3100 = vst [vmem:[%s3794_s26 + $0x248] sm:$0xf] %v3099_v2  ;;  %v3103_v4 = vld [vmem:[%s3789_s25 + $0x6e0] sm:$0xf]  ;;  %v3105_v5 = vld [vmem:[%s3789_s25 + $0x868] sm:$0xf] }
  0x73   : > { %3102 = vst [vmem:[%s3794_s26 + $0x30c] sm:$0xf] %v3101_v3  ;;  %3104 = vst [vmem:[%s3794_s26 + $0x3d0] sm:$0xf] %v3103_v4  ;;  %v3107_v6 = vld [vmem:[%s3789_s25 + $0x9f0] sm:$0xf] }
  0x74   : > { %3106 = vst [vmem:[%s3794_s26 + $0x494] sm:$0xf] %v3105_v5  ;;  %v3109_v7 = vld [vmem:[%s3789_s25 + $0xb78] sm:$0xf]  ;;  %3108 = vst [vmem:[%s3794_s26 + $0x558] sm:$0xf] %v3107_v6 }
  0x75   : > { %3110 = vst [vmem:[%s3794_s26 + $0x61c] sm:$0xf] %v3109_v7 }
  0x76 PF: > { %p3111_p5 = scmp.ge.s32.totalorder %s3730_s14, 1  ;;  %p564_p6 = scmp.lt.s32.totalorder %s3730_s14, 3 }
  0x78   : > { %p565_p7 = pnand %p3111_p5, %p564_p6 }
  0x79   : > { %s571_s4 = sand.u32 (!%p565_p7), 1, %s3722_s12   ;;  %s595_s28 = smul.u32 (!%p565_p7), 49, %s3090_s15 }
  0x7a   : > { %568 = sbr.rel (%p565_p7) target bundleno = 732 (0x2dc), region = 54 }
  0x7b   : > { %s3388_s5 = smul.u32 (!%p565_p7), 1568, %s571_s4  ;;  %p596_p8 = scmp.lt.s32.totalorder (!%p565_p7), %s595_s28, 97 }
  0x7d   : > { %s4213_s10 = scalar_lea.vmem (!%p565_p7), [#allocation2], %s3388_s5 }
  0x7f   : > { %v611_v8 = vld [vmem:[%s4559_s0 + $0x40] sm:$0x1]  ;;  %vm616_vm0 = vcmask 1040384   ;;  %v3732_v9 = vmov 0.0   ;;  %v610_v10 = vld [vmem:[%s4559_s0 + $0x38] sm:$0xff]  ;;  %vm3733_vm1 = vmmov 0  }
  0x80   : > { %3354 = vmatprep.subr.mxu0 %v3732_v9  ;;  %3372 = vmatprep.mubr.msk.f32.mxu0 %vm3733_vm1, %v3732_v9  ;;  %v609_v11 = vld [vmem:[%s4559_s0 + $0x30] sm:$0xff]  ;;  %v608_v12 = vld [vmem:[%s4559_s0 + $0x28] sm:$0xff]  ;;  %v3416_v13 = vld [vmem:[%s4213_s10 + $0x49c] ss:$196 sps:$4 sm:$0xff]   ;;  %vm612_vm2 = vcmask 531456   ;;  %v3734_v37 = vmov 0  }
  0x81   : > { %3355 = vmatpush3.msk.msra.mxu0 %vm616_vm0, %v611_v8  ;;  %v607_v14 = vld [vmem:[%s4559_s0 + $0x20] sm:$0xff]  ;;  %1887 = vmatprep.subr.bf16.mxu1 %v3416_v13  ;;  %v3421_v15 = vld [vmem:[%s4213_s10 + $0x498] ss:$196 sps:$4 sm:$0xff]   ;;  %v605_v18 = vld [vmem:[%s4559_s0 + $0x10] sm:$0xff]  ;;  %vm1875_vm3 = vcmask 523264   ;;  %s4567_s28 = smov (!%p596_p8, %s595_s28), 97 }
  0x82   : > { %3356 = vmatprep.subr.mxu0 %v3732_v9  ;;  %v3422_v16 = vld [vmem:[%s4213_s10 + $0x314] ss:$196 sps:$4 sm:$0xff]   ;;  %1888 = vmatpush1.bf16.msra.mxu1 %v3421_v15  ;;  %v3428_v20 = vld [vmem:[%s4213_s10 + $0x18c] ss:$196 sps:$4 sm:$0xff]   ;;  %v603_v22 = vld [vmem:[%s4559_s0] sm:$0xff]  ;;  %s3112_s29 = sshll.u32 %s4567_s28, 2 }
  0x83   : > { %3357 = vmatpush3.msra.mxu0 %v610_v10  ;;  %v606_v17 = vld [vmem:[%s4559_s0 + $0x18] sm:$0xff]  ;;  %1889 = vmatprep.subr.bf16.mxu1 %v3422_v16  ;;  %v3427_v19 = vld [vmem:[%s4213_s10 + $0x310] ss:$196 sps:$4 sm:$0xff]   ;;  %v604_v21 = vld [vmem:[%s4559_s0 + $0x8] sm:$0xff]  ;;  %s4522_s14 = scalar_lea.vmem %s4562_s3, %s3112_s29 }
  0x84   : > { %3358 = vmatprep.subr.mxu0 %v3732_v9  ;;  %v3420_v23 = vld [vmem:[%s4213_s10 + $0x4ac] ss:$196 sps:$4 sm:$0xff]   ;;  %v602_v25 = vld [vmem:[%s4560_s1] sm:$0xf]  ;;  %v3434_v27 = vld [vmem:[%s4213_s10 + $0x4] ss:$196 sps:$4 sm:$0xff]   ;;  %1911 = vmatprep.mubr.bf16.mxu1 %v3734_v37 }
  0x85   : > { %3359 = vmatpush3.msra.mxu0 %v609_v11  ;;  %v3433_v24 = vld [vmem:[%s4213_s10 + $0x188] ss:$196 sps:$4 sm:$0xff]   ;;  %v3439_v29 = vld [vmem:[%s4213_s10] ss:$196 sps:$4 sm:$0xff]   ;;  %v3430_v32 = vld [vmem:[%s4213_s10 + $0x198] ss:$196 sps:$4 sm:$0xff]  }
  0x86   : > { %3360 = vmatprep.subr.mxu0 %v3732_v9  ;;  %1890 = vmatpush1.bf16.msra.mxu1 %v3427_v19  ;;  %v3418_v26 = vld [vmem:[%s4213_s10 + $0x4a8] ss:$196 sps:$4 sm:$0xff]   ;;  %v3424_v30 = vld [vmem:[%s4213_s10 + $0x320] ss:$196 sps:$4 sm:$0xff]   ;;  %v3438_v33 = vld [vmem:[%s4213_s10 + $0x14] ss:$196 sps:$4 sm:$0xff]  }
  0x87   : > { %3361 = vmatpush3.msra.mxu0 %v608_v12  ;;  %1891 = vmatprep.subr.bf16.mxu1 %v3428_v20  ;;  %v3426_v28 = vld [vmem:[%s4213_s10 + $0x324] ss:$196 sps:$4 sm:$0xff]   ;;  %v3432_v31 = vld [vmem:[%s4213_s10 + $0x19c] ss:$196 sps:$4 sm:$0xff]   ;;  %v3436_v34 = vld [vmem:[%s4213_s10 + $0x10] ss:$196 sps:$4 sm:$0xff]  }
  0x88   : > { %3362 = vmatprep.subr.mxu0 %v3732_v9  ;;  %v3442_v35 = vld [vmem:[%s4213_s10 + $0x4a4] ss:$196 sps:$4 sm:$0xff]   ;;  %v3445_v36 = vld [vmem:[%s4213_s10 + $0x4bc] ss:$196 sps:$4 sm:$0xff]   ;;  %v3451_v43 = vld [vmem:[%s4213_s10 + $0x334] ss:$196 sps:$4 sm:$0xff]  }
  0x89   : > { %3363 = vmatpush3.msra.mxu0 %v607_v14  ;;  %v3440_v39 = vld [vmem:[%s4213_s10 + $0x4a0] ss:$196 sps:$4 sm:$0xff]   ;;  %v3443_v40 = vld [vmem:[%s4213_s10 + $0x4b8] ss:$196 sps:$4 sm:$0xff]   ;;  %v3449_v46 = vld [vmem:[%s4213_s10 + $0x330] ss:$196 sps:$4 sm:$0xff]  }
  0x8a   : > { %3364 = vmatprep.subr.mxu0 %v3732_v9  ;;  %1892 = vmatpush1.bf16.msra.mxu1 %v3433_v24  ;;  %v3448_v42 = vld [vmem:[%s4213_s10 + $0x31c] ss:$196 sps:$4 sm:$0xff]   ;;  %v3454_v47 = vld [vmem:[%s4213_s10 + $0x194] ss:$196 sps:$4 sm:$0xff]   ;;  %v3457_v48 = vld [vmem:[%s4213_s10 + $0x1ac] ss:$196 sps:$4 sm:$0xff]  }
  0x8b   : > { %3365 = vmatpush3.msra.mxu0 %v606_v17  ;;  %1893 = vmatprep.subr.bf16.mxu1 %v3434_v27  ;;  %v3446_v45 = vld [vmem:[%s4213_s10 + $0x318] ss:$196 sps:$4 sm:$0xff]   ;;  %v3452_v49 = vld [vmem:[%s4213_s10 + $0x190] ss:$196 sps:$4 sm:$0xff]   ;;  %v3455_v50 = vld [vmem:[%s4213_s10 + $0x1a8] ss:$196 sps:$4 sm:$0xff]  }
  0x8c   : > { %3366 = vmatprep.subr.mxu0 %v3732_v9  ;;  %v3460_v51 = vld [vmem:[%s4213_s10 + $0xc] ss:$196 sps:$4 sm:$0xff]   ;;  %v3463_v52 = vld [vmem:[%s4213_s10 + $0x24] ss:$196 sps:$4 sm:$0xff]   ;;  %v3466_v55 = vld [vmem:[%s4213_s10 + $0x4b4] ss:$196 sps:$4 sm:$0xff]  }
  0x8d   : > { %3367 = vmatpush3.msra.mxu0 %v605_v18  ;;  %v3458_v53 = vld [vmem:[%s4213_s10 + $0x8] ss:$196 sps:$4 sm:$0xff]   ;;  %v3461_v54 = vld [vmem:[%s4213_s10 + $0x20] ss:$196 sps:$4 sm:$0xff]   ;;  %v3464_v57 = vld [vmem:[%s4213_s10 + $0x4b0] ss:$196 sps:$4 sm:$0xff]  }
  0x8e   : > { %3368 = vmatprep.subr.mxu0 %v3732_v9  ;;  %1894 = vmatpush1.bf16.msra.mxu1 %v3439_v29  ;;  %v3469_v56 = vld [vmem:[%s4213_s10 + $0x4cc] ss:$196 sps:$4 sm:$0xff]   ;;  %v3475_v60 = vld [vmem:[%s4213_s10 + $0x344] ss:$196 sps:$4 sm:$0xff]   ;;  %v3481_v0 = vld [vmem:[%s4213_s10 + $0x1bc] ss:$196 sps:$4 sm:$0xff]  }
  0x8f   : > { %3369 = vmatpush3.msra.mxu0 %v604_v21  ;;  %1928 = vmatprep.subr.bf16.mxu1 %v3442_v35  ;;  %v3467_v58 = vld [vmem:[%s4213_s10 + $0x4c8] ss:$196 sps:$4 sm:$0xff]   ;;  %v3473_v62 = vld [vmem:[%s4213_s10 + $0x340] ss:$196 sps:$4 sm:$0xff]   ;;  %v3479_v2 = vld [vmem:[%s4213_s10 + $0x1b8] ss:$196 sps:$4 sm:$0xff]  }
  0x90   : > { %3370 = vmatprep.subr.mxu0 %v3732_v9  ;;  %v3472_v59 = vld [vmem:[%s4213_s10 + $0x32c] ss:$196 sps:$4 sm:$0xff]   ;;  %v3478_v63 = vld [vmem:[%s4213_s10 + $0x1a4] ss:$196 sps:$4 sm:$0xff]   ;;  %v3484_v3 = vld [vmem:[%s4213_s10 + $0x1c] ss:$196 sps:$4 sm:$0xff]  }
  0x91   : > { %3371 = vmatpush3.msra.mxu0 %v603_v22  ;;  %v3470_v61 = vld [vmem:[%s4213_s10 + $0x328] ss:$196 sps:$4 sm:$0xff]   ;;  %v3476_v1 = vld [vmem:[%s4213_s10 + $0x1a0] ss:$196 sps:$4 sm:$0xff]   ;;  %v3487_v4 = vld [vmem:[%s4213_s10 + $0x34] ss:$196 sps:$4 sm:$0xff]  }
  0x92   : > { %3373 = vmatmul.mubr.msk.f32.vlgmr.msra.gmra.mxu0 %vm612_vm2, %v602_v25  ;;  %1969 = vmatprep.subr.bf16.mxu0 %v3420_v23  ;;  %v3482_v5 = vld [vmem:[%s4213_s10 + $0x18] ss:$196 sps:$4 sm:$0xff]   ;;  %v3485_v6 = vld [vmem:[%s4213_s10 + $0x30] ss:$196 sps:$4 sm:$0xff]   ;;  %v3490_v7 = vld [vmem:[%s4213_s10 + $0x4c4] ss:$196 sps:$4 sm:$0xff]  }
  0x93   : > { %1970 = vmatpush1.bf16.msra.mxu0 %v3418_v26  ;;  %1993 = vmatprep.mubr.bf16.mxu0 %v3734_v37  ;;  %v3493_v8 = vld [vmem:[%s4213_s10 + $0x4dc] ss:$196 sps:$4 sm:$0xff]   ;;  %v3499_v13 = vld [vmem:[%s4213_s10 + $0x354] ss:$196 sps:$4 sm:$0xff]   ;;  %v3505_v17 = vld [vmem:[%s4213_s10 + $0x1cc] ss:$196 sps:$4 sm:$0xff]  }
  0x94   : > { %1971 = vmatprep.subr.bf16.mxu0 %v3426_v28  ;;  %v3488_v10 = vld [vmem:[%s4213_s10 + $0x4c0] ss:$196 sps:$4 sm:$0xff]   ;;  %v3491_v11 = vld [vmem:[%s4213_s10 + $0x4d8] ss:$196 sps:$4 sm:$0xff]   ;;  %v3497_v15 = vld [vmem:[%s4213_s10 + $0x350] ss:$196 sps:$4 sm:$0xff]  }
  0x95   : > { %v3496_v12 = vld [vmem:[%s4213_s10 + $0x33c] ss:$196 sps:$4 sm:$0xff]   ;;  %v3502_v16 = vld [vmem:[%s4213_s10 + $0x1b4] ss:$196 sps:$4 sm:$0xff]   ;;  %v3503_v19 = vld [vmem:[%s4213_s10 + $0x1c8] ss:$196 sps:$4 sm:$0xff]  }
  0x96   : > { %v3494_v14 = vld [vmem:[%s4213_s10 + $0x338] ss:$196 sps:$4 sm:$0xff]   ;;  %v3500_v18 = vld [vmem:[%s4213_s10 + $0x1b0] ss:$196 sps:$4 sm:$0xff]   ;;  %v3511_v21 = vld [vmem:[%s4213_s10 + $0x44] ss:$196 sps:$4 sm:$0xff]  }
  0x97   : > { %1972 = vmatpush1.bf16.msra.mxu0 %v3424_v30  ;;  %v3508_v20 = vld [vmem:[%s4213_s10 + $0x2c] ss:$196 sps:$4 sm:$0xff]   ;;  %v3509_v23 = vld [vmem:[%s4213_s10 + $0x40] ss:$196 sps:$4 sm:$0xff]   ;;  %v3514_v24 = vld [vmem:[%s4213_s10 + $0x4d4] ss:$196 sps:$4 sm:$0xff]  }
  0x98   : > { %1973 = vmatprep.subr.bf16.mxu0 %v3432_v31  ;;  %v3506_v22 = vld [vmem:[%s4213_s10 + $0x28] ss:$196 sps:$4 sm:$0xff]   ;;  %v3512_v26 = vld [vmem:[%s4213_s10 + $0x4d0] ss:$196 sps:$4 sm:$0xff]   ;;  %v3521_v31 = vld [vmem:[%s4213_s10 + $0x360] ss:$196 sps:$4 sm:$0xff]  }
  0x99   : > { %v3517_v25 = vld [vmem:[%s4213_s10 + $0x4ec] ss:$196 sps:$4 sm:$0xff]   ;;  %v3523_v29 = vld [vmem:[%s4213_s10 + $0x364] ss:$196 sps:$4 sm:$0xff]   ;;  %v3527_v35 = vld [vmem:[%s4213_s10 + $0x1d8] ss:$196 sps:$4 sm:$0xff]  }
  0x9a   : > { %v3515_v27 = vld [vmem:[%s4213_s10 + $0x4e8] ss:$196 sps:$4 sm:$0xff]  }
  0x9b   : > { %1974 = vmatpush1.bf16.msra.mxu0 %v3430_v32  ;;  %v3520_v28 = vld [vmem:[%s4213_s10 + $0x34c] ss:$196 sps:$4 sm:$0xff]   ;;  %v3526_v32 = vld [vmem:[%s4213_s10 + $0x1c4] ss:$196 sps:$4 sm:$0xff]  }
  0x9c   : > { %1975 = vmatprep.subr.bf16.mxu0 %v3438_v33  ;;  %v3518_v30 = vld [vmem:[%s4213_s10 + $0x348] ss:$196 sps:$4 sm:$0xff]   ;;  %v3529_v33 = vld [vmem:[%s4213_s10 + $0x1dc] ss:$196 sps:$4 sm:$0xff]  }
  0x9f   : > { %1976 = vmatpush1.bf16.msra.mxu0 %v3436_v34  ;;  %v3524_v34 = vld [vmem:[%s4213_s10 + $0x1c0] ss:$196 sps:$4 sm:$0xff]  }
  0xa0   : > { %2051 = vmatprep.subr.bf16.mxu0 %v3445_v36  ;;  %v3532_v36 = vld [vmem:[%s4213_s10 + $0x3c] ss:$196 sps:$4 sm:$0xff]  }
 0x152   : > { %v686_v38 = vpop.f32.mrf.mxu0 }
 0x153   : > { %v4261_v41 = vpack.c.bf16 %v686_v38, %v686_v38  ;;  %v3535_v38 = vld [vmem:[%s4213_s10 + $0x54] ss:$196 sps:$4 sm:$0xff]  }
 0x154   : > { %v3374_v44 = vpop.f32.mrf.mxu0 }
 0x155   : > { %3311 = vmatmul.mubr.msk.bf16.vlgmr.msra.gmra.mxu1 %vm1875_vm3, %v4261_v41  ;;  %3313 = vmatmul.mubr.msk.bf16.vlgmr.msra.gmra.mxu0 %vm1875_vm3, %v4261_v41  ;;  %v3536_v44 = vld [vmem:[%s4213_s10 + $0x4e0] ss:$196 sps:$4 sm:$0xff]  }
 0x156   : > { %1929 = vmatpush1.bf16.msra.mxu1 %v3440_v39  ;;  %2052 = vmatpush1.bf16.msra.mxu0 %v3443_v40  ;;  %v3530_v39 = vld [vmem:[%s4213_s10 + $0x38] ss:$196 sps:$4 sm:$0xff]   ;;  %v3533_v40 = vld [vmem:[%s4213_s10 + $0x50] ss:$196 sps:$4 sm:$0xff]  }
 0x157   : > { %1930 = vmatprep.subr.bf16.mxu1 %v3448_v42  ;;  %2053 = vmatprep.subr.bf16.mxu0 %v3451_v43  ;;  %v3538_v42 = vld [vmem:[%s4213_s10 + $0x4e4] ss:$196 sps:$4 sm:$0xff]   ;;  %v3541_v43 = vld [vmem:[%s4213_s10 + $0x4fc] ss:$196 sps:$4 sm:$0xff]  }
 0x158   : > { %1952 = vmatprep.mubr.bf16.mxu1 %v3734_v37  ;;  %2075 = vmatprep.mubr.bf16.mxu0 %v3734_v37 }
 0x15a   : > { %1931 = vmatpush1.bf16.msra.mxu1 %v3446_v45  ;;  %2054 = vmatpush1.bf16.msra.mxu0 %v3449_v46  ;;  %v3539_v45 = vld [vmem:[%s4213_s10 + $0x4f8] ss:$196 sps:$4 sm:$0xff]  }
 0x15b   : > { %1932 = vmatprep.subr.bf16.mxu1 %v3454_v47  ;;  %2055 = vmatprep.subr.bf16.mxu0 %v3457_v48  ;;  %v3544_v46 = vld [vmem:[%s4213_s10 + $0x35c] ss:$196 sps:$4 sm:$0xff]   ;;  %v3547_v47 = vld [vmem:[%s4213_s10 + $0x374] ss:$196 sps:$4 sm:$0xff]  }
 0x15c   : > { %v3542_v48 = vld [vmem:[%s4213_s10 + $0x358] ss:$196 sps:$4 sm:$0xff]  }
 0x15e   : > { %1933 = vmatpush1.bf16.msra.mxu1 %v3452_v49  ;;  %2056 = vmatpush1.bf16.msra.mxu0 %v3455_v50  ;;  %v3545_v49 = vld [vmem:[%s4213_s10 + $0x370] ss:$196 sps:$4 sm:$0xff]  }
 0x15f   : > { %1934 = vmatprep.subr.bf16.mxu1 %v3460_v51  ;;  %2057 = vmatprep.subr.bf16.mxu0 %v3463_v52  ;;  %v3550_v50 = vld [vmem:[%s4213_s10 + $0x1d4] ss:$196 sps:$4 sm:$0xff]   ;;  %v3553_v51 = vld [vmem:[%s4213_s10 + $0x1ec] ss:$196 sps:$4 sm:$0xff]  }
 0x160   : > { %v3548_v52 = vld [vmem:[%s4213_s10 + $0x1d0] ss:$196 sps:$4 sm:$0xff]  }
 0x162   : > { %1935 = vmatpush1.bf16.msra.mxu1 %v3458_v53  ;;  %2058 = vmatpush1.bf16.msra.mxu0 %v3461_v54  ;;  %v3551_v53 = vld [vmem:[%s4213_s10 + $0x1e8] ss:$196 sps:$4 sm:$0xff]  }
 0x163   : > { %2010 = vmatprep.subr.bf16.mxu1 %v3466_v55  ;;  %2133 = vmatprep.subr.bf16.mxu0 %v3469_v56  ;;  %v3556_v54 = vld [vmem:[%s4213_s10 + $0x4c] ss:$196 sps:$4 sm:$0xff]   ;;  %v3559_v55 = vld [vmem:[%s4213_s10 + $0x64] ss:$196 sps:$4 sm:$0xff]  }
 0x164   : > { %v3554_v56 = vld [vmem:[%s4213_s10 + $0x48] ss:$196 sps:$4 sm:$0xff]  }
 0x165   : > { %3312 = vmatmul.mubr.msk.bf16.vlgmr.msra.gmra.mxu1 %vm1875_vm3, %v4261_v41  ;;  %3315 = vmatmul.mubr.msk.bf16.vlgmr.msra.gmra.mxu0 %vm1875_vm3, %v4261_v41 }
 0x166   : > { %2011 = vmatpush1.bf16.msra.mxu1 %v3464_v57  ;;  %2134 = vmatpush1.bf16.msra.mxu0 %v3467_v58  ;;  %v3557_v57 = vld [vmem:[%s4213_s10 + $0x60] ss:$196 sps:$4 sm:$0xff]   ;;  %v3562_v58 = vld [vmem:[%s4213_s10 + $0x4f4] ss:$196 sps:$4 sm:$0xff]  }
 0x167   : > { %2012 = vmatprep.subr.bf16.mxu1 %v3472_v59  ;;  %2135 = vmatprep.subr.bf16.mxu0 %v3475_v60  ;;  %v3565_v59 = vld [vmem:[%s4213_s10 + $0x50c] ss:$196 sps:$4 sm:$0xff]  }
 0x168   : > { %2034 = vmatprep.mubr.bf16.mxu1 %v3734_v37  ;;  %2157 = vmatprep.mubr.bf16.mxu0 %v3734_v37  ;;  %v3560_v60 = vld [vmem:[%s4213_s10 + $0x4f0] ss:$196 sps:$4 sm:$0xff]  }
 0x16a   : > { %2013 = vmatpush1.bf16.msra.mxu1 %v3470_v61  ;;  %2136 = vmatpush1.bf16.msra.mxu0 %v3473_v62  ;;  %v3563_v61 = vld [vmem:[%s4213_s10 + $0x508] ss:$196 sps:$4 sm:$0xff]  }
 0x16b   : > { %2014 = vmatprep.subr.bf16.mxu1 %v3478_v63  ;;  %2137 = vmatprep.subr.bf16.mxu0 %v3481_v0  ;;  %v3568_v62 = vld [vmem:[%s4213_s10 + $0x36c] ss:$196 sps:$4 sm:$0xff]   ;;  %v3571_v63 = vld [vmem:[%s4213_s10 + $0x384] ss:$196 sps:$4 sm:$0xff]  }
 0x16c   : > { %v3566_v0 = vld [vmem:[%s4213_s10 + $0x368] ss:$196 sps:$4 sm:$0xff]  }
 0x16e   : > { %2015 = vmatpush1.bf16.msra.mxu1 %v3476_v1  ;;  %2138 = vmatpush1.bf16.msra.mxu0 %v3479_v2  ;;  %v3569_v1 = vld [vmem:[%s4213_s10 + $0x380] ss:$196 sps:$4 sm:$0xff]  }
 0x16f   : > { %2016 = vmatprep.subr.bf16.mxu1 %v3484_v3  ;;  %2139 = vmatprep.subr.bf16.mxu0 %v3487_v4  ;;  %v3574_v2 = vld [vmem:[%s4213_s10 + $0x1e4] ss:$196 sps:$4 sm:$0xff]   ;;  %v3577_v3 = vld [vmem:[%s4213_s10 + $0x1fc] ss:$196 sps:$4 sm:$0xff]  }
 0x170   : > { %v3572_v4 = vld [vmem:[%s4213_s10 + $0x1e0] ss:$196 sps:$4 sm:$0xff]  }
 0x172   : > { %2017 = vmatpush1.bf16.msra.mxu1 %v3482_v5  ;;  %2140 = vmatpush1.bf16.msra.mxu0 %v3485_v6  ;;  %v3575_v5 = vld [vmem:[%s4213_s10 + $0x1f8] ss:$196 sps:$4 sm:$0xff]  }
 0x173   : > { %2092 = vmatprep.subr.bf16.mxu1 %v3490_v7  ;;  %2215 = vmatprep.subr.bf16.mxu0 %v3493_v8  ;;  %v3580_v6 = vld [vmem:[%s4213_s10 + $0x5c] ss:$196 sps:$4 sm:$0xff]   ;;  %v3583_v7 = vld [vmem:[%s4213_s10 + $0x74] ss:$196 sps:$4 sm:$0xff]  }
 0x174   : > { %v3578_v8 = vld [vmem:[%s4213_s10 + $0x58] ss:$196 sps:$4 sm:$0xff]  }
 0x175   : > { %3314 = vmatmul.mubr.msk.bf16.vlgmr.msra.gmra.mxu1 %vm1875_vm3, %v4261_v41  ;;  %3317 = vmatmul.mubr.msk.bf16.vlgmr.msra.gmra.mxu0 %vm1875_vm3, %v4261_v41 }
 0x176   : > { %2093 = vmatpush1.bf16.msra.mxu1 %v3488_v10  ;;  %2216 = vmatpush1.bf16.msra.mxu0 %v3491_v11  ;;  %v3581_v10 = vld [vmem:[%s4213_s10 + $0x70] ss:$196 sps:$4 sm:$0xff]   ;;  %v3586_v11 = vld [vmem:[%s4213_s10 + $0x504] ss:$196 sps:$4 sm:$0xff]  }
 0x177   : > { %2094 = vmatprep.subr.bf16.mxu1 %v3496_v12  ;;  %2217 = vmatprep.subr.bf16.mxu0 %v3499_v13  ;;  %v3589_v12 = vld [vmem:[%s4213_s10 + $0x51c] ss:$196 sps:$4 sm:$0xff]  }
 0x178   : > { %2116 = vmatprep.mubr.bf16.mxu1 %v3734_v37  ;;  %2239 = vmatprep.mubr.bf16.mxu0 %v3734_v37  ;;  %v3584_v13 = vld [vmem:[%s4213_s10 + $0x500] ss:$196 sps:$4 sm:$0xff]  }
 0x17a   : > { %2095 = vmatpush1.bf16.msra.mxu1 %v3494_v14  ;;  %2218 = vmatpush1.bf16.msra.mxu0 %v3497_v15  ;;  %v3587_v14 = vld [vmem:[%s4213_s10 + $0x518] ss:$196 sps:$4 sm:$0xff]  }
 0x17b   : > { %2096 = vmatprep.subr.bf16.mxu1 %v3502_v16  ;;  %2219 = vmatprep.subr.bf16.mxu0 %v3505_v17  ;;  %v3592_v15 = vld [vmem:[%s4213_s10 + $0x37c] ss:$196 sps:$4 sm:$0xff]   ;;  %v3595_v16 = vld [vmem:[%s4213_s10 + $0x394] ss:$196 sps:$4 sm:$0xff]  }
 0x17c   : > { %v3590_v17 = vld [vmem:[%s4213_s10 + $0x378] ss:$196 sps:$4 sm:$0xff]  }
 0x17e   : > { %2097 = vmatpush1.bf16.msra.mxu1 %v3500_v18  ;;  %2220 = vmatpush1.bf16.msra.mxu0 %v3503_v19  ;;  %v3593_v18 = vld [vmem:[%s4213_s10 + $0x390] ss:$196 sps:$4 sm:$0xff]  }
 0x17f   : > { %2098 = vmatprep.subr.bf16.mxu1 %v3508_v20  ;;  %2221 = vmatprep.subr.bf16.mxu0 %v3511_v21  ;;  %v3598_v19 = vld [vmem:[%s4213_s10 + $0x1f4] ss:$196 sps:$4 sm:$0xff]   ;;  %v3601_v20 = vld [vmem:[%s4213_s10 + $0x20c] ss:$196 sps:$4 sm:$0xff]  }
 0x180   : > { %v3596_v21 = vld [vmem:[%s4213_s10 + $0x1f0] ss:$196 sps:$4 sm:$0xff]  }
 0x182   : > { %2099 = vmatpush1.bf16.msra.mxu1 %v3506_v22  ;;  %2222 = vmatpush1.bf16.msra.mxu0 %v3509_v23  ;;  %v3599_v22 = vld [vmem:[%s4213_s10 + $0x208] ss:$196 sps:$4 sm:$0xff]  }
 0x183   : > { %2174 = vmatprep.subr.bf16.mxu1 %v3514_v24  ;;  %2297 = vmatprep.subr.bf16.mxu0 %v3517_v25  ;;  %v3604_v23 = vld [vmem:[%s4213_s10 + $0x6c] ss:$196 sps:$4 sm:$0xff]   ;;  %v3607_v24 = vld [vmem:[%s4213_s10 + $0x84] ss:$196 sps:$4 sm:$0xff]  }
 0x184   : > { %v3602_v25 = vld [vmem:[%s4213_s10 + $0x68] ss:$196 sps:$4 sm:$0xff]  }
 0x185   : > { %3316 = vmatmul.mubr.msk.bf16.vlgmr.msra.gmra.mxu1 %vm1875_vm3, %v4261_v41  ;;  %3319 = vmatmul.mubr.msk.bf16.vlgmr.msra.gmra.mxu0 %vm1875_vm3, %v4261_v41 }
 0x186   : > { %2175 = vmatpush1.bf16.msra.mxu1 %v3512_v26  ;;  %2298 = vmatpush1.bf16.msra.mxu0 %v3515_v27  ;;  %v3605_v26 = vld [vmem:[%s4213_s10 + $0x80] ss:$196 sps:$4 sm:$0xff]   ;;  %v3610_v27 = vld [vmem:[%s4213_s10 + $0x514] ss:$196 sps:$4 sm:$0xff]  }
 0x187   : > { %2176 = vmatprep.subr.bf16.mxu1 %v3520_v28  ;;  %2299 = vmatprep.subr.bf16.mxu0 %v3523_v29  ;;  %v3613_v28 = vld [vmem:[%s4213_s10 + $0x52c] ss:$196 sps:$4 sm:$0xff]  }
 0x188   : > { %2198 = vmatprep.mubr.bf16.mxu1 %v3734_v37  ;;  %2321 = vmatprep.mubr.bf16.mxu0 %v3734_v37  ;;  %v3608_v29 = vld [vmem:[%s4213_s10 + $0x510] ss:$196 sps:$4 sm:$0xff]  }
 0x18a   : > { %2177 = vmatpush1.bf16.msra.mxu1 %v3518_v30  ;;  %2300 = vmatpush1.bf16.msra.mxu0 %v3521_v31  ;;  %v3611_v30 = vld [vmem:[%s4213_s10 + $0x528] ss:$196 sps:$4 sm:$0xff]  }
 0x18b   : > { %2178 = vmatprep.subr.bf16.mxu1 %v3526_v32  ;;  %2301 = vmatprep.subr.bf16.mxu0 %v3529_v33  ;;  %v3616_v31 = vld [vmem:[%s4213_s10 + $0x38c] ss:$196 sps:$4 sm:$0xff]   ;;  %v3619_v32 = vld [vmem:[%s4213_s10 + $0x3a4] ss:$196 sps:$4 sm:$0xff]  }
 0x18c   : > { %v3614_v33 = vld [vmem:[%s4213_s10 + $0x388] ss:$196 sps:$4 sm:$0xff]  }
 0x18e   : > { %2179 = vmatpush1.bf16.msra.mxu1 %v3524_v34  ;;  %2302 = vmatpush1.bf16.msra.mxu0 %v3527_v35  ;;  %v3617_v34 = vld [vmem:[%s4213_s10 + $0x3a0] ss:$196 sps:$4 sm:$0xff]  }
 0x18f   : > { %2180 = vmatprep.subr.bf16.mxu1 %v3532_v36  ;;  %2303 = vmatprep.subr.bf16.mxu0 %v3535_v38  ;;  %v3622_v35 = vld [vmem:[%s4213_s10 + $0x204] ss:$196 sps:$4 sm:$0xff]   ;;  %v3625_v36 = vld [vmem:[%s4213_s10 + $0x21c] ss:$196 sps:$4 sm:$0xff]  }
 0x190   : > { %v3620_v38 = vld [vmem:[%s4213_s10 + $0x200] ss:$196 sps:$4 sm:$0xff]  }
 0x192   : > { %2181 = vmatpush1.bf16.msra.mxu1 %v3530_v39  ;;  %2304 = vmatpush1.bf16.msra.mxu0 %v3533_v40  ;;  %v3623_v39 = vld [vmem:[%s4213_s10 + $0x218] ss:$196 sps:$4 sm:$0xff]  }
 0x193   : > { %2256 = vmatprep.subr.bf16.mxu1 %v3538_v42  ;;  %2379 = vmatprep.subr.bf16.mxu0 %v3541_v43  ;;  %v3628_v40 = vld [vmem:[%s4213_s10 + $0x7c] ss:$196 sps:$4 sm:$0xff]   ;;  %v3631_v42 = vld [vmem:[%s4213_s10 + $0x94] ss:$196 sps:$4 sm:$0xff]  }
 0x194   : > { %v3626_v43 = vld [vmem:[%s4213_s10 + $0x78] ss:$196 sps:$4 sm:$0xff]  }
 0x195   : > { %3318 = vmatmul.mubr.msk.bf16.vlgmr.msra.gmra.mxu1 %vm1875_vm3, %v4261_v41  ;;  %3321 = vmatmul.mubr.msk.bf16.vlgmr.msra.gmra.mxu0 %vm1875_vm3, %v4261_v41 }
 0x196   : > { %2257 = vmatpush1.bf16.msra.mxu1 %v3536_v44  ;;  %2380 = vmatpush1.bf16.msra.mxu0 %v3539_v45  ;;  %v3629_v44 = vld [vmem:[%s4213_s10 + $0x90] ss:$196 sps:$4 sm:$0xff]   ;;  %v3634_v45 = vld [vmem:[%s4213_s10 + $0x524] ss:$196 sps:$4 sm:$0xff]  }
 0x197   : > { %2258 = vmatprep.subr.bf16.mxu1 %v3544_v46  ;;  %2381 = vmatprep.subr.bf16.mxu0 %v3547_v47  ;;  %v3637_v46 = vld [vmem:[%s4213_s10 + $0x53c] ss:$196 sps:$4 sm:$0xff]  }
 0x198   : > { %2280 = vmatprep.mubr.bf16.mxu1 %v3734_v37  ;;  %2403 = vmatprep.mubr.bf16.mxu0 %v3734_v37  ;;  %v3632_v47 = vld [vmem:[%s4213_s10 + $0x520] ss:$196 sps:$4 sm:$0xff]  }
 0x19a   : > { %2259 = vmatpush1.bf16.msra.mxu1 %v3542_v48  ;;  %2382 = vmatpush1.bf16.msra.mxu0 %v3545_v49  ;;  %v3635_v48 = vld [vmem:[%s4213_s10 + $0x538] ss:$196 sps:$4 sm:$0xff]  }
 0x19b   : > { %2260 = vmatprep.subr.bf16.mxu1 %v3550_v50  ;;  %2383 = vmatprep.subr.bf16.mxu0 %v3553_v51  ;;  %v3640_v49 = vld [vmem:[%s4213_s10 + $0x39c] ss:$196 sps:$4 sm:$0xff]   ;;  %v3643_v50 = vld [vmem:[%s4213_s10 + $0x3b4] ss:$196 sps:$4 sm:$0xff]  }
 0x19c   : > { %v3638_v51 = vld [vmem:[%s4213_s10 + $0x398] ss:$196 sps:$4 sm:$0xff]  }
 0x19e   : > { %2261 = vmatpush1.bf16.msra.mxu1 %v3548_v52  ;;  %2384 = vmatpush1.bf16.msra.mxu0 %v3551_v53  ;;  %v3641_v52 = vld [vmem:[%s4213_s10 + $0x3b0] ss:$196 sps:$4 sm:$0xff]  }
 0x19f   : > { %2262 = vmatprep.subr.bf16.mxu1 %v3556_v54  ;;  %2385 = vmatprep.subr.bf16.mxu0 %v3559_v55  ;;  %v3646_v53 = vld [vmem:[%s4213_s10 + $0x214] ss:$196 sps:$4 sm:$0xff]   ;;  %v3649_v54 = vld [vmem:[%s4213_s10 + $0x22c] ss:$196 sps:$4 sm:$0xff]  }
 0x1a0   : > { %v3644_v55 = vld [vmem:[%s4213_s10 + $0x210] ss:$196 sps:$4 sm:$0xff]  }
 0x1a2   : > { %2263 = vmatpush1.bf16.msra.mxu1 %v3554_v56  ;;  %2386 = vmatpush1.bf16.msra.mxu0 %v3557_v57  ;;  %v3647_v56 = vld [vmem:[%s4213_s10 + $0x228] ss:$196 sps:$4 sm:$0xff]  }
 0x1a3   : > { %2338 = vmatprep.subr.bf16.mxu1 %v3562_v58  ;;  %2461 = vmatprep.subr.bf16.mxu0 %v3565_v59  ;;  %v3652_v57 = vld [vmem:[%s4213_s10 + $0x8c] ss:$196 sps:$4 sm:$0xff]   ;;  %v3655_v58 = vld [vmem:[%s4213_s10 + $0xa4] ss:$196 sps:$4 sm:$0xff]  }
 0x1a4   : > { %v3650_v59 = vld [vmem:[%s4213_s10 + $0x88] ss:$196 sps:$4 sm:$0xff]  }
 0x1a5   : > { %3320 = vmatmul.mubr.msk.bf16.vlgmr.msra.gmra.mxu1 %vm1875_vm3, %v4261_v41  ;;  %3323 = vmatmul.mubr.msk.bf16.vlgmr.msra.gmra.mxu0 %vm1875_vm3, %v4261_v41 }
 0x1a6   : > { %2339 = vmatpush1.bf16.msra.mxu1 %v3560_v60  ;;  %2462 = vmatpush1.bf16.msra.mxu0 %v3563_v61  ;;  %v3653_v60 = vld [vmem:[%s4213_s10 + $0xa0] ss:$196 sps:$4 sm:$0xff]   ;;  %v3658_v61 = vld [vmem:[%s4213_s10 + $0x534] ss:$196 sps:$4 sm:$0xff]  }
 0x1a7   : > { %2340 = vmatprep.subr.bf16.mxu1 %v3568_v62  ;;  %2463 = vmatprep.subr.bf16.mxu0 %v3571_v63  ;;  %v3661_v62 = vld [vmem:[%s4213_s10 + $0x54c] ss:$196 sps:$4 sm:$0xff]  }
 0x1a8   : > { %2362 = vmatprep.mubr.bf16.mxu1 %v3734_v37  ;;  %2485 = vmatprep.mubr.bf16.mxu0 %v3734_v37  ;;  %v3656_v63 = vld [vmem:[%s4213_s10 + $0x530] ss:$196 sps:$4 sm:$0xff]  }
 0x1aa   : > { %2341 = vmatpush1.bf16.msra.mxu1 %v3566_v0  ;;  %2464 = vmatpush1.bf16.msra.mxu0 %v3569_v1  ;;  %v3659_v0 = vld [vmem:[%s4213_s10 + $0x548] ss:$196 sps:$4 sm:$0xff]  }
 0x1ab   : > { %2342 = vmatprep.subr.bf16.mxu1 %v3574_v2  ;;  %2465 = vmatprep.subr.bf16.mxu0 %v3577_v3  ;;  %v3664_v1 = vld [vmem:[%s4213_s10 + $0x3ac] ss:$196 sps:$4 sm:$0xff]   ;;  %v3667_v2 = vld [vmem:[%s4213_s10 + $0x3c4] ss:$196 sps:$4 sm:$0xff]  }
 0x1ac   : > { %v3662_v3 = vld [vmem:[%s4213_s10 + $0x3a8] ss:$196 sps:$4 sm:$0xff]  }
 0x1ae   : > { %2343 = vmatpush1.bf16.msra.mxu1 %v3572_v4  ;;  %2466 = vmatpush1.bf16.msra.mxu0 %v3575_v5  ;;  %v3665_v4 = vld [vmem:[%s4213_s10 + $0x3c0] ss:$196 sps:$4 sm:$0xff]  }
 0x1af   : > { %2344 = vmatprep.subr.bf16.mxu1 %v3580_v6  ;;  %2467 = vmatprep.subr.bf16.mxu0 %v3583_v7  ;;  %v3670_v5 = vld [vmem:[%s4213_s10 + $0x224] ss:$196 sps:$4 sm:$0xff]   ;;  %v3673_v6 = vld [vmem:[%s4213_s10 + $0x23c] ss:$196 sps:$4 sm:$0xff]  }
 0x1b0   : > { %v3668_v7 = vld [vmem:[%s4213_s10 + $0x220] ss:$196 sps:$4 sm:$0xff]  }
 0x1b2   : > { %2345 = vmatpush1.bf16.msra.mxu1 %v3578_v8  ;;  %2468 = vmatpush1.bf16.msra.mxu0 %v3581_v10  ;;  %v3671_v8 = vld [vmem:[%s4213_s10 + $0x238] ss:$196 sps:$4 sm:$0xff]  }
 0x1b3   : > { %2420 = vmatprep.subr.bf16.mxu1 %v3586_v11  ;;  %2543 = vmatprep.subr.bf16.mxu0 %v3589_v12  ;;  %v3676_v10 = vld [vmem:[%s4213_s10 + $0x9c] ss:$196 sps:$4 sm:$0xff]   ;;  %v3679_v11 = vld [vmem:[%s4213_s10 + $0xb4] ss:$196 sps:$4 sm:$0xff]  }
 0x1b4   : > { %v3674_v12 = vld [vmem:[%s4213_s10 + $0x98] ss:$196 sps:$4 sm:$0xff]  }
 0x1b5   : > { %3322 = vmatmul.mubr.msk.bf16.vlgmr.msra.gmra.mxu1 %vm1875_vm3, %v4261_v41  ;;  %3325 = vmatmul.mubr.msk.bf16.vlgmr.msra.gmra.mxu0 %vm1875_vm3, %v4261_v41 }
 0x1b6   : > { %2421 = vmatpush1.bf16.msra.mxu1 %v3584_v13  ;;  %2544 = vmatpush1.bf16.msra.mxu0 %v3587_v14  ;;  %v3677_v13 = vld [vmem:[%s4213_s10 + $0xb0] ss:$196 sps:$4 sm:$0xff]   ;;  %v3682_v14 = vld [vmem:[%s4213_s10 + $0x544] ss:$196 sps:$4 sm:$0xff]  }
 0x1b7   : > { %2422 = vmatprep.subr.bf16.mxu1 %v3592_v15  ;;  %2545 = vmatprep.subr.bf16.mxu0 %v3595_v16  ;;  %v3680_v15 = vld [vmem:[%s4213_s10 + $0x540] ss:$196 sps:$4 sm:$0xff]   ;;  %v3683_v16 = vld [vmem:[%s4213_s10 + $0x558] ss:$196 sps:$4 sm:$0xff]  }
 0x1b8   : > { %2444 = vmatprep.mubr.bf16.mxu1 %v3734_v37  ;;  %2567 = vmatprep.mubr.bf16.mxu0 %v3734_v37 }
 0x1ba   : > { %2423 = vmatpush1.bf16.msra.mxu1 %v3590_v17  ;;  %2546 = vmatpush1.bf16.msra.mxu0 %v3593_v18  ;;  %v3686_v17 = vld [vmem:[%s4213_s10 + $0x3bc] ss:$196 sps:$4 sm:$0xff]  }
 0x1bb   : > { %2424 = vmatprep.subr.bf16.mxu1 %v3598_v19  ;;  %2547 = vmatprep.subr.bf16.mxu0 %v3601_v20  ;;  %v3684_v18 = vld [vmem:[%s4213_s10 + $0x3b8] ss:$196 sps:$4 sm:$0xff]   ;;  %v3687_v19 = vld [vmem:[%s4213_s10 + $0x3d0] ss:$196 sps:$4 sm:$0xff]  }
 0x1bc   : > { %v3690_v20 = vld [vmem:[%s4213_s10 + $0x234] ss:$196 sps:$4 sm:$0xff]  }
 0x1be   : > { %2425 = vmatpush1.bf16.msra.mxu1 %v3596_v21  ;;  %2548 = vmatpush1.bf16.msra.mxu0 %v3599_v22  ;;  %v3688_v21 = vld [vmem:[%s4213_s10 + $0x230] ss:$196 sps:$4 sm:$0xff]   ;;  %v3691_v22 = vld [vmem:[%s4213_s10 + $0x248] ss:$196 sps:$4 sm:$0xff]  }
 0x1bf   : > { %2426 = vmatprep.subr.bf16.mxu1 %v3604_v23  ;;  %2549 = vmatprep.subr.bf16.mxu0 %v3607_v24  ;;  %v3694_v23 = vld [vmem:[%s4213_s10 + $0xac] ss:$196 sps:$4 sm:$0xff]  }
 0x1c0   : > { %v3692_v24 = vld [vmem:[%s4213_s10 + $0xa8] ss:$196 sps:$4 sm:$0xff]  }
 0x1c2   : > { %2427 = vmatpush1.bf16.msra.mxu1 %v3602_v25  ;;  %2550 = vmatpush1.bf16.msra.mxu0 %v3605_v26  ;;  %v3695_v25 = vld [vmem:[%s4213_s10 + $0xc0] ss:$196 sps:$4 sm:$0xff]   ;;  %v3698_v26 = vld [vmem:[%s4213_s10 + $0x554] ss:$196 sps:$4 sm:$0xff]  }
 0x1c3   : > { %2502 = vmatprep.subr.bf16.mxu1 %v3610_v27  ;;  %2625 = vmatprep.subr.bf16.mxu0 %v3613_v28  ;;  %v3696_v27 = vld [vmem:[%s4213_s10 + $0x550] ss:$196 sps:$4 sm:$0xff]  }
 0x1c4   : > { %v3701_v28 = vld [vmem:[%s4213_s10 + $0x3cc] ss:$196 sps:$4 sm:$0xff]  }
 0x1c5   : > { %3324 = vmatmul.mubr.msk.bf16.vlgmr.msra.gmra.mxu1 %vm1875_vm3, %v4261_v41  ;;  %3327 = vmatmul.mubr.msk.bf16.vlgmr.msra.gmra.mxu0 %vm1875_vm3, %v4261_v41 }
 0x1c6   : > { %2503 = vmatpush1.bf16.msra.mxu1 %v3608_v29  ;;  %2626 = vmatpush1.bf16.msra.mxu0 %v3611_v30  ;;  %v3699_v29 = vld [vmem:[%s4213_s10 + $0x3c8] ss:$196 sps:$4 sm:$0xff]   ;;  %v3702_v30 = vld [vmem:[%s4213_s10 + $0x240] ss:$196 sps:$4 sm:$0xff]  }
 0x1c7   : > { %2504 = vmatprep.subr.bf16.mxu1 %v3616_v31  ;;  %2627 = vmatprep.subr.bf16.mxu0 %v3619_v32  ;;  %v3707_v31 = vld [vmem:[%s4213_s10 + $0xbc] ss:$196 sps:$4 sm:$0xff]  }
 0x1c8   : > { %2526 = vmatprep.mubr.bf16.mxu1 %v3734_v37  ;;  %2649 = vmatprep.mubr.bf16.mxu0 %v3734_v37  ;;  %v3705_v32 = vld [vmem:[%s4213_s10 + $0xb8] ss:$196 sps:$4 sm:$0xff]  }
 0x1ca   : > { %2505 = vmatpush1.bf16.msra.mxu1 %v3614_v33  ;;  %2628 = vmatpush1.bf16.msra.mxu0 %v3617_v34 }
 0x1cb   : > { %2506 = vmatprep.subr.bf16.mxu1 %v3622_v35  ;;  %2629 = vmatprep.subr.bf16.mxu0 %v3625_v36 }
 0x1ce   : > { %2507 = vmatpush1.bf16.msra.mxu1 %v3620_v38  ;;  %2630 = vmatpush1.bf16.msra.mxu0 %v3623_v39 }
 0x1cf   : > { %2508 = vmatprep.subr.bf16.mxu1 %v3628_v40  ;;  %2631 = vmatprep.subr.bf16.mxu0 %v3631_v42 }
 0x1d2   : > { %2509 = vmatpush1.bf16.msra.mxu1 %v3626_v43  ;;  %2632 = vmatpush1.bf16.msra.mxu0 %v3629_v44 }
 0x1d3   : > { %2584 = vmatprep.subr.bf16.mxu1 %v3634_v45  ;;  %2707 = vmatprep.subr.bf16.mxu0 %v3637_v46 }
 0x1d5   : > { %3326 = vmatmul.mubr.msk.bf16.vlgmr.msra.gmra.mxu1 %vm1875_vm3, %v4261_v41  ;;  %3329 = vmatmul.mubr.msk.bf16.vlgmr.msra.gmra.mxu0 %vm1875_vm3, %v4261_v41 }
 0x1d6   : > { %2585 = vmatpush1.bf16.msra.mxu1 %v3632_v47  ;;  %2708 = vmatpush1.bf16.msra.mxu0 %v3635_v48 }
 0x1d7   : > { %2586 = vmatprep.subr.bf16.mxu1 %v3640_v49  ;;  %2709 = vmatprep.subr.bf16.mxu0 %v3643_v50 }
 0x1d8   : > { %2608 = vmatprep.mubr.bf16.mxu1 %v3734_v37  ;;  %2731 = vmatprep.mubr.bf16.mxu0 %v3734_v37 }
 0x1da   : > { %2587 = vmatpush1.bf16.msra.mxu1 %v3638_v51  ;;  %2710 = vmatpush1.bf16.msra.mxu0 %v3641_v52 }
 0x1db   : > { %2588 = vmatprep.subr.bf16.mxu1 %v3646_v53  ;;  %2711 = vmatprep.subr.bf16.mxu0 %v3649_v54 }
 0x1de   : > { %2589 = vmatpush1.bf16.msra.mxu1 %v3644_v55  ;;  %2712 = vmatpush1.bf16.msra.mxu0 %v3647_v56 }
 0x1df   : > { %2590 = vmatprep.subr.bf16.mxu1 %v3652_v57  ;;  %2713 = vmatprep.subr.bf16.mxu0 %v3655_v58 }
 0x1e2   : > { %2591 = vmatpush1.bf16.msra.mxu1 %v3650_v59  ;;  %2714 = vmatpush1.bf16.msra.mxu0 %v3653_v60 }
 0x1e3   : > { %2666 = vmatprep.subr.bf16.mxu1 %v3658_v61  ;;  %2789 = vmatprep.subr.bf16.mxu0 %v3661_v62 }
 0x1e5   : > { %3328 = vmatmul.mubr.msk.bf16.vlgmr.msra.gmra.mxu1 %vm1875_vm3, %v4261_v41  ;;  %3331 = vmatmul.mubr.msk.bf16.vlgmr.msra.gmra.mxu0 %vm1875_vm3, %v4261_v41 }
 0x1e6   : > { %2667 = vmatpush1.bf16.msra.mxu1 %v3656_v63  ;;  %2790 = vmatpush1.bf16.msra.mxu0 %v3659_v0 }
 0x1e7   : > { %2668 = vmatprep.subr.bf16.mxu1 %v3664_v1  ;;  %2791 = vmatprep.subr.bf16.mxu0 %v3667_v2 }
 0x1e8   : > { %2690 = vmatprep.mubr.bf16.mxu1 %v3734_v37  ;;  %2813 = vmatprep.mubr.bf16.mxu0 %v3734_v37 }
 0x1ea   : > { %2669 = vmatpush1.bf16.msra.mxu1 %v3662_v3  ;;  %2792 = vmatpush1.bf16.msra.mxu0 %v3665_v4 }
 0x1eb   : > { %2670 = vmatprep.subr.bf16.mxu1 %v3670_v5  ;;  %2793 = vmatprep.subr.bf16.mxu0 %v3673_v6 }
 0x1ee   : > { %2671 = vmatpush1.bf16.msra.mxu1 %v3668_v7  ;;  %2794 = vmatpush1.bf16.msra.mxu0 %v3671_v8 }
 0x1ef   : > { %2672 = vmatprep.subr.bf16.mxu1 %v3676_v10  ;;  %2795 = vmatprep.subr.bf16.mxu0 %v3679_v11 }
 0x1f2   : > { %2673 = vmatpush1.bf16.msra.mxu1 %v3674_v12  ;;  %2796 = vmatpush1.bf16.msra.mxu0 %v3677_v13 }
 0x1f3   : > { %2748 = vmatprep.subr.bf16.mxu1 %v3682_v14  ;;  %3375 = vmatprep.subr.bf16.mxu0 %v3732_v9 }
 0x1f5   : > { %3330 = vmatmul.mubr.msk.bf16.vlgmr.msra.gmra.mxu1 %vm1875_vm3, %v4261_v41  ;;  %3333 = vmatmul.mubr.msk.bf16.vlgmr.msra.gmra.mxu0 %vm1875_vm3, %v4261_v41 }
 0x1f6   : > { %2749 = vmatpush1.bf16.msra.mxu1 %v3680_v15  ;;  %3376 = vmatpush3.bf16.msra.mxu0 %v3683_v16 }
 0x1f7   : > { %2750 = vmatprep.subr.bf16.mxu1 %v3686_v17  ;;  %3377 = vmatprep.subr.bf16.mxu0 %v3732_v9 }
 0x1f8   : > { %2772 = vmatprep.mubr.bf16.mxu1 %v3734_v37  ;;  %3383 = vmatprep.mubr.msk.bf16.mxu0 %vm3733_vm1, %v3732_v9 }
 0x1fa   : > { %2751 = vmatpush1.bf16.msra.mxu1 %v3684_v18  ;;  %3378 = vmatpush3.bf16.msra.mxu0 %v3687_v19 }
 0x1fb   : > { %2752 = vmatprep.subr.bf16.mxu1 %v3690_v20  ;;  %3379 = vmatprep.subr.bf16.mxu0 %v3732_v9 }
 0x1fe   : > { %2753 = vmatpush1.bf16.msra.mxu1 %v3688_v21  ;;  %3380 = vmatpush3.bf16.msra.mxu0 %v3691_v22 }
 0x1ff   : > { %2754 = vmatprep.subr.bf16.mxu1 %v3694_v23  ;;  %3381 = vmatprep.subr.bf16.mxu0 %v3732_v9  ;;  %v3704_v9 = vld [vmem:[%s4213_s10 + $0x244] ss:$196 sps:$4 sm:$0xff]  }
 0x202   : > { %2755 = vmatpush1.bf16.msra.mxu1 %v3692_v24  ;;  %3382 = vmatpush3.bf16.msra.mxu0 %v3695_v25 }
 0x203   : > { %2830 = vmatprep.subr.bf16.mxu1 %v3698_v26 }
 0x205   : > { %3332 = vmatmul.mubr.msk.bf16.vlgmr.msra.gmra.mxu1 %vm1875_vm3, %v4261_v41  ;;  %3384 = vmatmul.mubr.msk.bf16.vlgmr.msra.gmra.mxu0 %vm1875_vm3, %v4261_v41 }
 0x206   : > { %2831 = vmatpush1.bf16.msra.mxu1 %v3696_v27  ;;  %2854 = vmatprep.mubr.bf16.mxu1 %v3734_v37 }
 0x207   : > { %2832 = vmatprep.subr.bf16.mxu1 %v3701_v28 }
 0x20a   : > { %2833 = vmatpush1.bf16.msra.mxu1 %v3699_v29 }
 0x20b   : > { %2834 = vmatprep.subr.bf16.mxu1 %v3704_v9 }
 0x20e   : > { %2835 = vmatpush1.bf16.msra.mxu1 %v3702_v30 }
 0x20f   : > { %2836 = vmatprep.subr.bf16.mxu1 %v3707_v31 }
 0x212   : > { %2837 = vmatpush1.bf16.msra.mxu1 %v3705_v32 }
 0x215   : > { %3334 = vmatmul.mubr.msk.bf16.vlgmr.msra.gmra.mxu1 %vm1875_vm3, %v4261_v41  ;;  %v1913_v33 = vpop.f32.mrf.mxu1  ;;  %v1995_v37 = vpop.f32.mrf.mxu0 }
 0x217   : > { %v1915_v34 = vpop.f32.mrf.mxu1  ;;  %v1997_v35 = vpop.f32.mrf.mxu0 }
 0x218   : > { %v2951_v36 = vcombine.low %v1913_v33, %v1915_v34  ;;  %v2953_v38 = vcombine.low %v1995_v37, %v1997_v35 }
 0x219   : > { %v1917_v39 = vpop.f32.mrf.mxu1  ;;  %v1999_v40 = vpop.f32.mrf.mxu0 }
 0x21a   : > { %2999 = vst [vmem:[%s4522_s14] sm:$0xff] %v2951_v36  ;;  %3001 = vst [vmem:[%s4522_s14 + $0x10] sm:$0xff] %v2953_v38 }
 0x21b   : > { %v1918_v41 = vpop.f32.mrf.mxu1  ;;  %v2000_v42 = vpop.f32.mrf.mxu0 }
 0x225   : > { %v1954_v43 = vpop.f32.mrf.mxu1  ;;  %v2077_v44 = vpop.f32.mrf.mxu0 }
 0x227   : > { %v1956_v45 = vpop.f32.mrf.mxu1  ;;  %v2079_v46 = vpop.f32.mrf.mxu0 }
 0x228   : > { %v2952_v47 = vcombine.low %v1954_v43, %v1956_v45  ;;  %v2955_v48 = vcombine.low %v2077_v44, %v2079_v46 }
 0x229   : > { %v1958_v49 = vpop.f32.mrf.mxu1  ;;  %v2081_v50 = vpop.f32.mrf.mxu0 }
 0x22a   : > { %3000 = vst [vmem:[%s4522_s14 + $0x8] sm:$0xff] %v2952_v47  ;;  %3003 = vst [vmem:[%s4522_s14 + $0x20] sm:$0xff] %v2955_v48 }
 0x22b   : > { %v1959_v51 = vpop.f32.mrf.mxu1  ;;  %v2082_v52 = vpop.f32.mrf.mxu0 }
 0x235   : > { %v2036_v53 = vpop.f32.mrf.mxu1  ;;  %v2159_v54 = vpop.f32.mrf.mxu0 }
 0x237   : > { %v2038_v55 = vpop.f32.mrf.mxu1  ;;  %v2161_v56 = vpop.f32.mrf.mxu0 }
 0x238   : > { %v2954_v57 = vcombine.low %v2036_v53, %v2038_v55  ;;  %v2957_v58 = vcombine.low %v2159_v54, %v2161_v56 }
 0x239   : > { %v2040_v59 = vpop.f32.mrf.mxu1  ;;  %v2163_v60 = vpop.f32.mrf.mxu0 }
 0x23a   : > { %3002 = vst [vmem:[%s4522_s14 + $0x18] sm:$0xff] %v2954_v57  ;;  %3005 = vst [vmem:[%s4522_s14 + $0x30] sm:$0xff] %v2957_v58 }
 0x23b   : > { %v2041_v61 = vpop.f32.mrf.mxu1  ;;  %v2164_v62 = vpop.f32.mrf.mxu0 }
 0x245   : > { %v2118_v63 = vpop.f32.mrf.mxu1  ;;  %v2241_v0 = vpop.f32.mrf.mxu0 }
 0x247   : > { %v2120_v1 = vpop.f32.mrf.mxu1  ;;  %v2243_v2 = vpop.f32.mrf.mxu0 }
 0x248   : > { %v2956_v3 = vcombine.low %v2118_v63, %v2120_v1  ;;  %v2959_v4 = vcombine.low %v2241_v0, %v2243_v2 }
 0x249   : > { %v2122_v5 = vpop.f32.mrf.mxu1  ;;  %v2245_v6 = vpop.f32.mrf.mxu0 }
 0x24a   : > { %3004 = vst [vmem:[%s4522_s14 + $0x28] sm:$0xff] %v2956_v3  ;;  %3007 = vst [vmem:[%s4522_s14 + $0x40] sm:$0xff] %v2959_v4 }
 0x24b   : > { %v2123_v7 = vpop.f32.mrf.mxu1  ;;  %v2246_v8 = vpop.f32.mrf.mxu0 }
 0x255   : > { %v2200_v10 = vpop.f32.mrf.mxu1  ;;  %v2323_v11 = vpop.f32.mrf.mxu0 }
 0x257   : > { %v2202_v12 = vpop.f32.mrf.mxu1  ;;  %v2325_v13 = vpop.f32.mrf.mxu0 }
 0x258   : > { %v2958_v14 = vcombine.low %v2200_v10, %v2202_v12  ;;  %v2961_v15 = vcombine.low %v2323_v11, %v2325_v13 }
 0x259   : > { %v2204_v16 = vpop.f32.mrf.mxu1  ;;  %v2327_v17 = vpop.f32.mrf.mxu0 }
 0x25a   : > { %3006 = vst [vmem:[%s4522_s14 + $0x38] sm:$0xff] %v2958_v14  ;;  %3009 = vst [vmem:[%s4522_s14 + $0x50] sm:$0xff] %v2961_v15 }
 0x25b   : > { %v2205_v18 = vpop.f32.mrf.mxu1  ;;  %v2328_v19 = vpop.f32.mrf.mxu0 }
 0x265   : > { %v2282_v20 = vpop.f32.mrf.mxu1  ;;  %v2405_v21 = vpop.f32.mrf.mxu0 }
 0x267   : > { %v2284_v22 = vpop.f32.mrf.mxu1  ;;  %v2407_v23 = vpop.f32.mrf.mxu0 }
 0x268   : > { %v2960_v24 = vcombine.low %v2282_v20, %v2284_v22  ;;  %v2963_v25 = vcombine.low %v2405_v21, %v2407_v23 }
 0x269   : > { %v2286_v26 = vpop.f32.mrf.mxu1  ;;  %v2409_v27 = vpop.f32.mrf.mxu0 }
 0x26a   : > { %3008 = vst [vmem:[%s4522_s14 + $0x48] sm:$0xff] %v2960_v24  ;;  %3011 = vst [vmem:[%s4522_s14 + $0x60] sm:$0xff] %v2963_v25 }
 0x26b   : > { %v2287_v28 = vpop.f32.mrf.mxu1  ;;  %v2410_v29 = vpop.f32.mrf.mxu0 }
 0x275   : > { %v2364_v9 = vpop.f32.mrf.mxu1  ;;  %v2487_v30 = vpop.f32.mrf.mxu0 }
 0x277   : > { %v2366_v31 = vpop.f32.mrf.mxu1  ;;  %v2489_v32 = vpop.f32.mrf.mxu0 }
 0x278   : > { %v2962_v33 = vcombine.low %v2364_v9, %v2366_v31  ;;  %v2965_v37 = vcombine.low %v2487_v30, %v2489_v32 }
 0x279   : > { %v2368_v34 = vpop.f32.mrf.mxu1  ;;  %v2491_v35 = vpop.f32.mrf.mxu0 }
 0x27a   : > { %3010 = vst [vmem:[%s4522_s14 + $0x58] sm:$0xff] %v2962_v33  ;;  %3013 = vst [vmem:[%s4522_s14 + $0x70] sm:$0xff] %v2965_v37 }
 0x27b   : > { %v2369_v36 = vpop.f32.mrf.mxu1  ;;  %v2492_v38 = vpop.f32.mrf.mxu0 }
 0x285   : > { %v2446_v39 = vpop.f32.mrf.mxu1  ;;  %v2569_v40 = vpop.f32.mrf.mxu0 }
 0x287   : > { %v2448_v41 = vpop.f32.mrf.mxu1  ;;  %v2571_v42 = vpop.f32.mrf.mxu0 }
 0x288   : > { %v2964_v43 = vcombine.low %v2446_v39, %v2448_v41  ;;  %v2967_v44 = vcombine.low %v2569_v40, %v2571_v42 }
 0x289   : > { %v2450_v45 = vpop.f32.mrf.mxu1  ;;  %v2573_v46 = vpop.f32.mrf.mxu0 }
 0x28a   : > { %3012 = vst [vmem:[%s4522_s14 + $0x68] sm:$0xff] %v2964_v43  ;;  %3015 = vst [vmem:[%s4522_s14 + $0x80] sm:$0xff] %v2967_v44 }
 0x28b   : > { %v2451_v47 = vpop.f32.mrf.mxu1  ;;  %v2574_v48 = vpop.f32.mrf.mxu0 }
 0x295   : > { %v2528_v49 = vpop.f32.mrf.mxu1  ;;  %v2651_v50 = vpop.f32.mrf.mxu0 }
 0x297   : > { %v2530_v51 = vpop.f32.mrf.mxu1  ;;  %v2653_v52 = vpop.f32.mrf.mxu0 }
 0x298   : > { %v2966_v53 = vcombine.low %v2528_v49, %v2530_v51  ;;  %v2969_v54 = vcombine.low %v2651_v50, %v2653_v52 }
 0x299   : > { %v2532_v55 = vpop.f32.mrf.mxu1  ;;  %v2655_v56 = vpop.f32.mrf.mxu0 }
 0x29a   : > { %3014 = vst [vmem:[%s4522_s14 + $0x78] sm:$0xff] %v2966_v53  ;;  %3017 = vst [vmem:[%s4522_s14 + $0x90] sm:$0xff] %v2969_v54 }
 0x29b   : > { %v2533_v57 = vpop.f32.mrf.mxu1  ;;  %v2656_v58 = vpop.f32.mrf.mxu0 }
 0x2a5   : > { %v2610_v59 = vpop.f32.mrf.mxu1  ;;  %v2733_v60 = vpop.f32.mrf.mxu0 }
 0x2a7   : > { %v2612_v61 = vpop.f32.mrf.mxu1  ;;  %v2735_v62 = vpop.f32.mrf.mxu0 }
 0x2a8   : > { %v2968_v63 = vcombine.low %v2610_v59, %v2612_v61  ;;  %v2971_v0 = vcombine.low %v2733_v60, %v2735_v62 }
 0x2a9   : > { %v2614_v1 = vpop.f32.mrf.mxu1  ;;  %v2737_v2 = vpop.f32.mrf.mxu0 }
 0x2aa   : > { %3016 = vst [vmem:[%s4522_s14 + $0x88] sm:$0xff] %v2968_v63  ;;  %3019 = vst [vmem:[%s4522_s14 + $0xa0] sm:$0xff] %v2971_v0 }
 0x2ab   : > { %v2615_v3 = vpop.f32.mrf.mxu1  ;;  %v2738_v4 = vpop.f32.mrf.mxu0 }
 0x2b5   : > { %v2692_v5 = vpop.f32.mrf.mxu1  ;;  %v2815_v6 = vpop.f32.mrf.mxu0 }
 0x2b7   : > { %v2694_v7 = vpop.f32.mrf.mxu1  ;;  %v2817_v8 = vpop.f32.mrf.mxu0 }
 0x2b8   : > { %v2970_v10 = vcombine.low %v2692_v5, %v2694_v7  ;;  %v2973_v11 = vcombine.low %v2815_v6, %v2817_v8 }
 0x2b9   : > { %v2696_v12 = vpop.f32.mrf.mxu1  ;;  %v2819_v13 = vpop.f32.mrf.mxu0 }
 0x2ba   : > { %3018 = vst [vmem:[%s4522_s14 + $0x98] sm:$0xff] %v2970_v10  ;;  %3021 = vst [vmem:[%s4522_s14 + $0xb0] sm:$0xff] %v2973_v11 }
 0x2bb   : > { %v2697_v14 = vpop.f32.mrf.mxu1  ;;  %v2820_v15 = vpop.f32.mrf.mxu0 }
 0x2c5   : > { %v2774_v16 = vpop.f32.mrf.mxu1  ;;  %v2897_v17 = vpop.f32.mrf.mxu0 }
 0x2c6   : > { %3023 = vst [vmem:[%s4522_s14 + $0xc0] sm:$0xf] %v2897_v17 }
 0x2c7   : > { %v2776_v18 = vpop.f32.mrf.mxu1  ;;  %v3385_v19 = vpop.f32.mrf.mxu0 }
 0x2c8   : > { %v2972_v20 = vcombine.low %v2774_v16, %v2776_v18 }
 0x2c9   : > { %v2778_v21 = vpop.f32.mrf.mxu1  ;;  %v2900_v22 = vpop.f32.mrf.mxu0 }
 0x2ca   : > { %3020 = vst [vmem:[%s4522_s14 + $0xa8] sm:$0xff] %v2972_v20 }
 0x2cb   : > { %v2779_v23 = vpop.f32.mrf.mxu1  ;;  %v3386_v24 = vpop.f32.mrf.mxu0 }
 0x2d5   : > { %v2856_v25 = vpop.f32.mrf.mxu1 }
 0x2d7   : > { %v2858_v26 = vpop.f32.mrf.mxu1 }
 0x2d8   : > { %v2974_v27 = vcombine.low %v2856_v25, %v2858_v26 }
 0x2d9   : > { %v2860_v28 = vpop.f32.mrf.mxu1 }
 0x2da   : > { %3022 = vst [vmem:[%s4522_s14 + $0xb8] sm:$0xff] %v2974_v27 }
 0x2db   : > { %v2861_v29 = vpop.f32.mrf.mxu1 }
 0x2dc PF: > { %p10_p9 = scmp.ge.s32.totalorder %s3772_s16, 4   ;;  %s4563_s12 = smov %s3726_s13 }
 0x2dd   : > { %s4564_s13 = smov %s3781_s19  ;;  %s4565_s14 = smov %s3772_s16 }
 0x2de   :  { %12 = sbr.rel (!%p10_p9) target bundleno = 2 (0x2), region = 99 }

</bundles_post_ra>
